<compile_context>
chip_gen: v7x
topology: tpu7x:2x2x1
jax: 0.10.0
libtpu: 0.0.40
codegen_flags: <defaults>
</compile_context>

<pallas_src>
import functools
import math

import jax
import jax.numpy as jnp
from jax import lax
from jax.experimental import pallas as pl
from jax.experimental.pallas import tpu as pltpu


def _round_up(x, m):
    return (x + m - 1) // m * m


def _gelu_exact(x):
    # nn.GELU() default is the exact (erf) formulation.
    return 0.5 * x * (1.0 + lax.erf(x * (1.0 / math.sqrt(2.0))))


def mlp_kernel(x_ref, w1_ref, b1_ref, w2_ref, b2_ref, o_ref, acc_ref):
    # x_ref:   (tm, H)   token tile (resident across the I grid axis)
    # w1_ref:  (H, ti)   expansion-weight block for this I tile
    # b1_ref:  (1, ti)   expansion-bias block
    # w2_ref:  (ti, H)   contraction-weight block
    # b2_ref:  (1, H)    contraction bias
    # o_ref:   (tm, H)   output tile (written on the last I block)
    # acc_ref: (tm, H)   f32 accumulator scratch
    j = pl.program_id(1)

    @pl.when(j == 0)
    def _init():
        acc_ref[...] = jnp.zeros_like(acc_ref)

    # First matmul for this I block: (tm, H) @ (H, ti) -> (tm, ti), f32 acc.
    # Operands stay in their native dtype (bf16 hits the full-rate MXU path).
    h = jnp.dot(x_ref[...], w1_ref[...], preferred_element_type=jnp.float32)
    h = h + b1_ref[...].astype(jnp.float32)
    h = _gelu_exact(h)

    # Partial second matmul: (tm, ti) @ (ti, H), accumulated in f32 scratch.
    acc_ref[...] += jnp.dot(h.astype(w2_ref.dtype), w2_ref[...],
                            preferred_element_type=jnp.float32)

    @pl.when(j == pl.num_programs(1) - 1)
    def _finalize():
        o_ref[...] = (acc_ref[...] +
                      b2_ref[...].astype(jnp.float32)).astype(o_ref.dtype)


def mlp_pallas(x, w1, b1, w2, b2, *, tile_m=256, tile_i=256):
    """x: [B, S, H]; w1: [H, I]; b1: [I]; w2: [I, H]; b2: [H] -> [B, S, H]."""
    B, S, H = x.shape
    Hw, I = w1.shape
    assert Hw == H and w2.shape == (I, H) and b1.shape == (I,) and b2.shape == (H,)

    dtype = x.dtype
    itemsize = jnp.dtype(dtype).itemsize
    sub = {1: 32, 2: 16, 4: 8}[itemsize]      # sublane multiple for this dtype

    M = B * S
    tm = min(tile_m, _round_up(M, sub))       # token tile (multiple of sublane)
    ti = min(tile_i, _round_up(I, 128))       # intermediate tile (multiple of 128)

    M_pad = _round_up(M, tm)
    H_pad = _round_up(H, 128)                 # lane-dense output stores
    I_pad = _round_up(I, ti)

    # Zero-pad: padded I columns give GELU(0)=0 -> no contribution; padded
    # H/M slots are sliced off below.
    x2d = x.reshape(M, H)
    if (M_pad, H_pad) != (M, H):
        x2d = jnp.pad(x2d, ((0, M_pad - M), (0, H_pad - H)))
    w1p = jnp.pad(w1, ((0, H_pad - H), (0, I_pad - I))) if (H_pad, I_pad) != (H, I) else w1
    w2p = jnp.pad(w2, ((0, I_pad - I), (0, H_pad - H))) if (H_pad, I_pad) != (H, I) else w2
    b1p = jnp.pad(b1, (0, I_pad - I)).reshape(1, I_pad)
    b2p = jnp.pad(b2, (0, H_pad - H)).reshape(1, H_pad)

    grid = (M_pad // tm, I_pad // ti)

    # VMEM budget: double-buffered x / w1 / w2 / out tiles + f32 accumulator.
    vmem_need = (
        2 * tm * H_pad * itemsize
        + 2 * H_pad * ti * itemsize
        + 2 * ti * H_pad * itemsize
        + 2 * tm * H_pad * itemsize
        + tm * H_pad * 4
        + 2 * (ti + H_pad) * itemsize
    )
    vmem_limit = min(max(int(1.5 * vmem_need) + (2 << 20), 16 << 20), 48 << 20)

    out2d = pl.pallas_call(
        mlp_kernel,
        out_shape=jax.ShapeDtypeStruct((M_pad, H_pad), dtype),
        grid_spec=pltpu.PrefetchScalarGridSpec(
            num_scalar_prefetch=0,
            grid=grid,
            in_specs=[
                pl.BlockSpec((tm, H_pad), lambda i, j: (i, 0)),   # x tile
                pl.BlockSpec((H_pad, ti), lambda i, j: (0, j)),   # w1 block
                pl.BlockSpec((1, ti), lambda i, j: (0, j)),       # b1 block
                pl.BlockSpec((ti, H_pad), lambda i, j: (j, 0)),   # w2 block
                pl.BlockSpec((1, H_pad), lambda i, j: (0, 0)),    # b2
            ],
            out_specs=pl.BlockSpec((tm, H_pad), lambda i, j: (i, 0)),
            scratch_shapes=[pltpu.VMEM((tm, H_pad), jnp.float32)],
        ),
        compiler_params=pltpu.CompilerParams(
            dimension_semantics=("parallel", "arbitrary"),
            vmem_limit_bytes=vmem_limit,
        ),
    )(x2d, w1p, b1p, w2p, b2p)

    return out2d[:M, :H].reshape(B, S, H)


def mlp_reference(x, w1, b1, w2, b2):
    h = jnp.einsum("bsh,hi->bsi", x, w1, precision=lax.Precision.HIGHEST) + b1
    h = 0.5 * h * (1.0 + lax.erf(h / jnp.sqrt(2.0).astype(h.dtype)))
    return jnp.einsum("bsi,ih->bsh", h, w2, precision=lax.Precision.HIGHEST) + b2


if __name__ == "__main__":
    # Small, MXU/lane-aligned config: [batch, seq, hidden] input.
    batch, seq, hidden, intermediate = 2, 128, 256, 1024

    key = jax.random.PRNGKey(0)
    k_x, k_w1, k_b1, k_w2, k_b2 = jax.random.split(key, 5)

    x = jax.random.normal(k_x, (batch, seq, hidden), dtype=jnp.float32)

    # Deterministic init mimicking nn.Linear's uniform(-1/sqrt(fan_in), 1/sqrt(fan_in)).
    lim1 = 1.0 / math.sqrt(hidden)
    w1 = jax.random.uniform(k_w1, (hidden, intermediate), jnp.float32, -lim1, lim1)
    b1 = jax.random.uniform(k_b1, (intermediate,), jnp.float32, -lim1, lim1)
    lim2 = 1.0 / math.sqrt(intermediate)
    w2 = jax.random.uniform(k_w2, (intermediate, hidden), jnp.float32, -lim2, lim2)
    b2 = jax.random.uniform(k_b2, (hidden,), jnp.float32, -lim2, lim2)

    run = jax.jit(functools.partial(mlp_pallas, tile_m=256, tile_i=256))
    out = run(x, w1, b1, w2, b2)
    jax.block_until_ready(out)

    ref = mlp_reference(x, w1, b1, w2, b2)
    assert out.shape == (batch, seq, hidden)
    assert jnp.allclose(out, ref, atol=1e-4, rtol=1e-4), "mismatch vs reference"

    print("KERNEL_OK")
</pallas_src>

<mosaic_0001>
module attributes {stable_mosaic.version = 11 : i64} {
  func.func @mlp_kernel(%arg0: i32, %arg1: i32, %arg2: memref<256x256xf32, #tpu.memory_space<vmem>>, %arg3: memref<256x256xf32, #tpu.memory_space<vmem>>, %arg4: memref<1x256xf32, #tpu.memory_space<vmem>>, %arg5: memref<256x256xf32, #tpu.memory_space<vmem>>, %arg6: memref<1x256xf32, #tpu.memory_space<vmem>>, %arg7: memref<256x256xf32, #tpu.memory_space<vmem>>, %arg8: memref<256x256xf32, #tpu.memory_space<vmem>>) attributes {dimension_semantics = [#tpu.dimension_semantics<parallel>, #tpu.dimension_semantics<arbitrary>], iteration_bounds = array<i64: 1, 4>, scalar_prefetch = 0 : i64, scratch_operands = 1 : i64, tpu.core_type = #tpu.core_type<tc>, window_params = [{transform_indices = @transform_0, window_bounds = array<i64: 256, 256>}, {transform_indices = @transform_1, window_bounds = array<i64: 256, 256>}, {transform_indices = @transform_2, window_bounds = array<i64: 1, 256>}, {transform_indices = @transform_3, window_bounds = array<i64: 256, 256>}, {pipeline_mode = #tpu.pipeline_mode<synchronous>, transform_indices = @transform_4, window_bounds = array<i64: 1, 256>}, {transform_indices = @transform_5, window_bounds = array<i64: 256, 256>}]} {
    %c0_i32 = arith.constant 0 : i32
    %0 = arith.cmpi eq, %arg1, %c0_i32 : i32
    %1 = arith.extui %0 : i1 to i32
    %c0_i32_0 = arith.constant 0 : i32
    %2 = arith.cmpi ne, %1, %c0_i32_0 : i32
    scf.if %2 {
      %cst_17 = arith.constant 0.000000e+00 : f32
      %25 = vector.broadcast %cst_17 : f32 to vector<256x256xf32>
      %c0_18 = arith.constant 0 : index
      %c0_19 = arith.constant 0 : index
      %26 = vector.load %arg8[%c0_18, %c0_19] : memref<256x256xf32, #tpu.memory_space<vmem>>, vector<256x256xf32>
      tpu.vector_store %arg8[%c0_18, %c0_19], %25 {strides = array<i32>} : memref<256x256xf32, #tpu.memory_space<vmem>>, vector<256x256xf32>,
    } else {
    }
    %c0 = arith.constant 0 : index
    %c0_1 = arith.constant 0 : index
    %3 = vector.load %arg2[%c0, %c0_1] : memref<256x256xf32, #tpu.memory_space<vmem>>, vector<256x256xf32>
    %c0_2 = arith.constant 0 : index
    %c0_3 = arith.constant 0 : index
    %4 = vector.load %arg3[%c0_2, %c0_3] : memref<256x256xf32, #tpu.memory_space<vmem>>, vector<256x256xf32>
    %cst = arith.constant dense<0.000000e+00> : vector<256x256xf32>
    %5 = tpu.matmul %3, %4, %cst {dimension_numbers = #tpu.dot_dimension_numbers<[1], [0], [0], [1], [0, 0, 1, 1], [], []>} : vector<256x256xf32>, vector<256x256xf32>, vector<256x256xf32> -> vector<256x256xf32>
    %c0_4 = arith.constant 0 : index
    %c0_5 = arith.constant 0 : index
    %6 = vector.load %arg4[%c0_4, %c0_5] : memref<1x256xf32, #tpu.memory_space<vmem>>, vector<1x256xf32>
    %7 = vector.broadcast %6 : vector<1x256xf32> to vector<256x256xf32>
    %8 = arith.addf %5, %7 : vector<256x256xf32>
    %cst_6 = arith.constant 5.000000e-01 : f32
    %9 = vector.broadcast %cst_6 : f32 to vector<256x256xf32>
    %10 = arith.mulf %9, %8 : vector<256x256xf32>
    %cst_7 = arith.constant 0.707106769 : f32
    %11 = vector.broadcast %cst_7 : f32 to vector<256x256xf32>
    %12 = arith.mulf %8, %11 : vector<256x256xf32>
    %13 = math.erf %12 : vector<256x256xf32>
    %cst_8 = arith.constant 1.000000e+00 : f32
    %14 = vector.broadcast %cst_8 : f32 to vector<256x256xf32>
    %15 = arith.addf %14, %13 : vector<256x256xf32>
    %16 = arith.mulf %10, %15 : vector<256x256xf32>
    %c0_9 = arith.constant 0 : index
    %c0_10 = arith.constant 0 : index
    %17 = vector.load %arg8[%c0_9, %c0_10] : memref<256x256xf32, #tpu.memory_space<vmem>>, vector<256x256xf32>
    %c0_11 = arith.constant 0 : index
    %c0_12 = arith.constant 0 : index
    %18 = vector.load %arg5[%c0_11, %c0_12] : memref<256x256xf32, #tpu.memory_space<vmem>>, vector<256x256xf32>
    %cst_13 = arith.constant dense<0.000000e+00> : vector<256x256xf32>
    %19 = tpu.matmul %16, %18, %cst_13 {dimension_numbers = #tpu.dot_dimension_numbers<[1], [0], [0], [1], [0, 0, 1, 1], [], []>} : vector<256x256xf32>, vector<256x256xf32>, vector<256x256xf32> -> vector<256x256xf32>
    %20 = arith.addf %17, %19 : vector<256x256xf32>
    %c0_14 = arith.constant 0 : index
    %c0_15 = arith.constant 0 : index
    %21 = vector.load %arg8[%c0_14, %c0_15] : memref<256x256xf32, #tpu.memory_space<vmem>>, vector<256x256xf32>
    tpu.vector_store %arg8[%c0_14, %c0_15], %20 {strides = array<i32>} : memref<256x256xf32, #tpu.memory_space<vmem>>, vector<256x256xf32>,
    %c3_i32 = arith.constant 3 : i32
    %22 = arith.cmpi eq, %arg1, %c3_i32 : i32
    %23 = arith.extui %22 : i1 to i32
    %c0_i32_16 = arith.constant 0 : i32
    %24 = arith.cmpi ne, %23, %c0_i32_16 : i32
    scf.if %24 {
      %c0_17 = arith.constant 0 : index
      %c0_18 = arith.constant 0 : index
      %25 = vector.load %arg8[%c0_17, %c0_18] : memref<256x256xf32, #tpu.memory_space<vmem>>, vector<256x256xf32>
      %c0_19 = arith.constant 0 : index
      %c0_20 = arith.constant 0 : index
      %26 = vector.load %arg6[%c0_19, %c0_20] : memref<1x256xf32, #tpu.memory_space<vmem>>, vector<1x256xf32>
      %27 = vector.broadcast %26 : vector<1x256xf32> to vector<256x256xf32>
      %28 = arith.addf %25, %27 : vector<256x256xf32>
      %c0_21 = arith.constant 0 : index
      %c0_22 = arith.constant 0 : index
      %29 = vector.load %arg7[%c0_21, %c0_22] : memref<256x256xf32, #tpu.memory_space<vmem>>, vector<256x256xf32>
      tpu.vector_store %arg7[%c0_21, %c0_22], %28 {strides = array<i32>} : memref<256x256xf32, #tpu.memory_space<vmem>>, vector<256x256xf32>,
    } else {
    }
    return
  }
  func.func @transform_0(%arg0: i32, %arg1: i32) -> (i32, i32) {
    %c0_i32 = arith.constant 0 : i32
    %c0_i32_0 = arith.constant 0 : i32
    return %arg0, %c0_i32 : i32, i32
  }
  func.func @transform_1(%arg0: i32, %arg1: i32) -> (i32, i32) {
    %c0_i32 = arith.constant 0 : i32
    %c0_i32_0 = arith.constant 0 : i32
    return %c0_i32, %arg1 : i32, i32
  }
  func.func @transform_2(%arg0: i32, %arg1: i32) -> (i32, i32) {
    %c0_i32 = arith.constant 0 : i32
    %c0_i32_0 = arith.constant 0 : i32
    return %c0_i32, %arg1 : i32, i32
  }
  func.func @transform_3(%arg0: i32, %arg1: i32) -> (i32, i32) {
    %c0_i32 = arith.constant 0 : i32
    %c0_i32_0 = arith.constant 0 : i32
    return %arg1, %c0_i32 : i32, i32
  }
  func.func @transform_4(%arg0: i32, %arg1: i32) -> (i32, i32) {
    %c0_i32 = arith.constant 0 : i32
    %c0_i32_0 = arith.constant 0 : i32
    %c0_i32_1 = arith.constant 0 : i32
    return %c0_i32, %c0_i32_0 : i32, i32
  }
  func.func @transform_5(%arg0: i32, %arg1: i32) -> (i32, i32) {
    %c0_i32 = arith.constant 0 : i32
    %c0_i32_0 = arith.constant 0 : i32
    return %arg0, %c0_i32 : i32, i32
  }
}

</mosaic_0001>

<bundles_post_ra>
// kernel: mlp_pallas.1
= control target key start
LH: loop header
LB: loop body
LE: loop exit
PB: predicated region body
PF: predicated region fallthrough
CT: control target
= control target key end

     0   :  { %10 = vsyncpa [#allocation4], 0  ;;  %s3341_s0 = inlined_call_operand.hbm [shape: f32[256,256], index: 0, kind: input, shape index: {}]   ;;  %s3342_s1 = inlined_call_operand.hbm [shape: f32[256,1024], index: 1, kind: input, shape index: {}]   ;;  %s3343_s2 = inlined_call_operand.vmem [shape: f32[1,1024], index: 2, kind: input, shape index: {}]   ;;  %s3344_s3 = inlined_call_operand.hbm [shape: f32[1024,256], index: 3, kind: input, shape index: {}]   ;;  %s3345_s4 = inlined_call_operand.vmem [shape: f32[1,256], index: 4, kind: input, shape index: {}]   ;;  %s3346_s5 = inlined_call_operand.hbm [shape: f32[256,256], index: 5, kind: output, shape index: {}]  }
   0x1   :  { %11 = vsyncpa [#allocation7], 0 }
   0x2   :  { %13 = vsyncpa [#allocation7 + $0x1], 0 }
   0x3   :  { %14 = vsyncpa [#allocation5], 0  ;;  %s2535_s18 = smov 0   ;;  %s2537_s19 = smov 0  }
   0x4   :  { %s2539_s20 = smov 0   ;;  %s2541_s21 = smov 0  }
   0x5   :  { %s2543_s22 = smov 0   ;;  %s2545_s23 = smov 0  }
   0x6 LB: > { %s29_s24 = sadd.s32 1, %s2489_s22  ;;  %s65_s25 = sadd.s32 1, %s2481_s20  ;;  %s2493_s23 = sphi %s2545_s23, %s20_s23   ;;  %s2489_s22 = sphi %s2543_s22, %s3363_s22   ;;  %s2485_s21 = sphi %s2541_s21, %s3362_s21   ;;  %s2481_s20 = sphi %s2539_s20, %s3361_s20   ;;  %s2477_s19 = sphi %s2537_s19, %s3360_s19   ;;  %s2473_s18 = sphi %s2535_s18, %s3359_s18  }
   0x7   : > { %p30_p0 = scmp.ge.s32.totalorder %s29_s24, 4  ;;  %p72_p1 = scmp.ne.s32.totalorder %s2481_s20, %s2477_s19 }
   0x8   : > { %p73_p2 = scmp.eq.s32.totalorder %s2493_s23, 0  ;;  %p2133_p5 = scmp.lt.s32.totalorder %s2493_s23, 4 }
   0x9   : > { %s3365_s24 = smov (%p30_p0, %s29_s24), 0  ;;  %s221_s28 = sand.u32 1, %s2493_s23  }
   0xa   : > { %p2572_p3 = por %p73_p2, %p72_p1  ;;  %s62_s27 = ssub.s32 %s2489_s22, %s3365_s24 }
   0xb   : > { %p63_p4 = scmp.eq.s32.totalorder %s62_s27, 0  ;;  %s223_s29 = sand.u32 1, %s2481_s20  }
   0xc   : > { %s2584_s6 = sshll.u32 %s223_s29, 9  ;;  %s1978_s7 = sshll.u32 %s2489_s22, 8 }
   0xd   : > { %s2582_s30 = scalar_select %p63_p4, %s2481_s20, %s65_s25  }
   0xe   : > { %s2590_s10 = scalar_lea.hbm %s3342_s1, %s1978_s7  ;;  %s225_s11 = scalar_lea.vmem [#allocation6], %s2584_s6 }
   0xf   : > { %s232_s12 = sshll.u32 %s225_s11, 4  ;;  %p2597_p6 = pnand %p2133_p5, %p2572_p3  ;;  %s2593_s12 = int_to_ptr.vmem [resolvable:$true] %s232_s12 }
  0x10   : > { %s2601_s14 = scalar_lea.sflag [#allocation7], %s221_s28  ;;  %s2321_s15 = scalar_lea.hbm %s2590_s10, 8192 }
  0x11   : > { %p2322_p7 = scmp.ne.s32.totalorder %s2590_s10, %s2321_s15  ;;  %p2323_p8 = pneg %p2597_p6 }
  0x12   : > { %s2326_s25 = scalar_lea.hbm %s3342_s1, 32768  ;;  %p2327_p11 = scmp.lt.u32.totalorder %s2590_s10, %s3342_s1 }
  0x13   : > { %p2324_p9 = pnand %p2323_p8, %p2322_p7  ;;  %p2328_p12 = scmp.lt.u32.totalorder %s2326_s25, %s2321_s15 }
  0x14   : > { %p2330_p0 = scmp.lt.u32.totalorder %s2321_s15, %s2590_s10 }
  0x15   : > { %p2325_p10 = pneg %p2324_p9  ;;  %p2329_p13 = por %p2328_p12, %p2327_p11 }
  0x17   : > { %p2331_p1 = por %p2330_p0, %p2329_p13 }
  0x19   : > { %p2332_p2 = pnand %p2331_p1, %p2325_p10 }
  0x1b   : > { %2335 = shalt.err (!%p2332_p2)
}
  0x1c   : > { %s2336_s28 = scalar_lea.vmem %s2593_s12, 8192  ;;  %s2495_s29 = smov [#allocation6]  }
  0x1d   : > { %p2337_p3 = scmp.ne.s32.totalorder %s2593_s12, %s2336_s28  ;;  %s2341_s7 = sshll.u32 %s2495_s29, 4  ;;  %s2342_s7 = int_to_ptr.vmem [resolvable:$false] %s2341_s7 }
  0x1e   : > { %s2343_s8 = scalar_lea.vmem %s2342_s7, 16384  ;;  %p2344_p7 = scmp.lt.s32.totalorder %s2593_s12, %s2342_s7 }
  0x1f   : > { %p2339_p4 = pnand %p2337_p3, %p2323_p8  ;;  %p2345_p9 = scmp.lt.s32.totalorder %s2343_s8, %s2336_s28 }
  0x21   : > { %p2340_p5 = pneg %p2339_p4  ;;  %p2346_p11 = por %p2345_p9, %p2344_p7 }
  0x23   : > { %p2347_p12 = pnand %p2346_p11, %p2340_p5 }
  0x25   : > { %2350 = shalt.err (!%p2347_p12)
}
  0x26   : > { %s2496_s9 = smov 1024   ;;  %s2497_s11 = smov 256  }
  0x27   : > { %s2498_s15 = smov 16   ;;  %s2632_s16 = sadd.s32 4294967295, %s2493_s23  }
  0x28   : > { %2128 = dma.hbm_to_vmem [thread:$0]  (!%p2597_p6), %s2590_s10, 8192, %s2593_s12, %s2601_s14, %s2496_s9, %s2497_s11, %s2498_s15  }
  0x29   : > { %p78_p10 = scmp.ne.s32.totalorder %s2477_s19, %s2473_s18  ;;  %p3347_p13 = scmp.eq.s32.totalorder %s2632_s16, 0 }
  0x2a   : > { %p1957_p0 = scmp.ge.s32.totalorder %s2493_s23, 1  ;;  %p188_p1 = scmp.lt.s32.totalorder %s2493_s23, 5 }
  0x2b   : > { %p2641_p2 = por %p3347_p13, %p78_p10  ;;  %s2499_s10 = smov [#allocation3]  }
  0x2c   : > { %p2645_p3 = pnand %p1957_p0, %p188_p1  ;;  %s204_s12 = sshll.u32 %s2499_s10, 4  ;;  %s2649_s12 = int_to_ptr.vmem [resolvable:$true] %s204_s12 }
  0x2d   : > { %s3352_s17 = scalar_select %p2641_p2, 1, 0 }
  0x2e   : > { %s3353_s25 = scalar_select %p2645_p3, 1, 0 }
  0x2f   : > { %p2121_p4 = pneg %p2645_p3  ;;  %s1980_s18 = sshll.u32 %s2489_s22, 13 }
  0x30   : > { %s2657_s28 = scalar_lea.hbm %s3344_s3, %s1980_s18  ;;  %s254_s29 = scalar_lea.vmem [#allocation8], %s2584_s6 }
  0x31   : > { %s262_s7 = sshll.u32 %s254_s29, 4  ;;  %p2662_p5 = pnand %p2121_p4, %p3347_p13  ;;  %s2666_s7 = int_to_ptr.vmem [resolvable:$true] %s262_s7 }
  0x32   : > { %s2351_s9 = scalar_lea.hbm %s2657_s28, 8192  ;;  %s2356_s26 = scalar_lea.hbm %s3344_s3, 32768 }
  0x33   : > { %p2352_p7 = scmp.ne.s32.totalorder %s2657_s28, %s2351_s9  ;;  %p2357_p12 = scmp.lt.u32.totalorder %s2657_s28, %s3344_s3 }
  0x34   : > { %p2358_p10 = scmp.lt.u32.totalorder %s2356_s26, %s2351_s9  ;;  %p2360_p1 = scmp.lt.u32.totalorder %s2351_s9, %s2657_s28 }
  0x35   : > { %p2354_p9 = pnand %p2352_p7, %p2323_p8 }
  0x36   : > { %p2359_p0 = por %p2358_p10, %p2357_p12 }
  0x37   : > { %p2355_p11 = pneg %p2354_p9 }
  0x38   : > { %p2361_p4 = por %p2360_p1, %p2359_p0 }
  0x3a   : > { %p2362_p13 = pnand %p2361_p4, %p2355_p11 }
  0x3c   : > { %2365 = shalt.err (!%p2362_p13)
}
  0x3d   : > { %s2366_s29 = scalar_lea.vmem %s2666_s7, 8192  ;;  %s2500_s10 = smov [#allocation8]  }
  0x3e   : > { %p2367_p7 = scmp.ne.s32.totalorder %s2666_s7, %s2366_s29  ;;  %s2371_s18 = sshll.u32 %s2500_s10, 4  ;;  %s2372_s18 = int_to_ptr.vmem [resolvable:$false] %s2371_s18 }
  0x3f   : > { %s2373_s27 = scalar_lea.vmem %s2372_s18, 16384  ;;  %p2374_p3 = scmp.lt.s32.totalorder %s2666_s7, %s2372_s18 }
  0x40   : > { %p2369_p9 = pnand %p2367_p7, %p2323_p8  ;;  %p2375_p12 = scmp.lt.s32.totalorder %s2373_s27, %s2366_s29 }
  0x42   : > { %p2370_p2 = pneg %p2369_p9  ;;  %p2376_p10 = por %p2375_p12, %p2374_p3 }
  0x44   : > { %p2377_p0 = pnand %p2376_p10, %p2370_p2 }
  0x46   : > { %2380 = shalt.err (!%p2377_p0)
}
  0x47   : > { %2131 = dma.hbm_to_vmem [thread:$0]  (!%p2597_p6), %s2657_s28, 8192, %s2666_s7, %s2601_s14, %s2497_s11, %s2497_s11, %s2498_s15  }
  0x48   : > { %s2381_s6 = scalar_lea.hbm %s3341_s0, 8192  ;;  %p2383_p13 = pneg %p2662_p5 }
  0x49   : > { %p2382_p8 = scmp.ne.s32.totalorder %s3341_s0, %s2381_s6  ;;  %p2388_p11 = scmp.lt.u32.totalorder %s2381_s6, %s3341_s0 }
  0x4b   : > { %p2384_p2 = pnand %p2383_p13, %p2382_p8 }
  0x4d   : > { %p2385_p3 = pneg %p2384_p2 }
  0x4f   : > { %p2390_p1 = pnand %p2388_p11, %p2385_p3 }
  0x51   : > { %2393 = shalt.err (!%p2390_p1)
}
  0x52   : > { %s2394_s14 = scalar_lea.vmem %s2649_s12, 8192  ;;  %p2402_p9 = scmp.lt.s32.totalorder %s2649_s12, %s2649_s12 }
  0x53   : > { %p2395_p6 = scmp.ne.s32.totalorder %s2649_s12, %s2394_s14  ;;  %p2403_p12 = scmp.lt.s32.totalorder %s2394_s14, %s2394_s14 }
  0x55   : > { %p2397_p4 = pnand %p2395_p6, %p2383_p13  ;;  %p2404_p10 = por %p2403_p12, %p2402_p9 }
  0x57   : > { %p2398_p7 = pneg %p2397_p4 }
  0x59   : > { %p2405_p0 = pnand %p2404_p10, %p2398_p7 }
  0x5b   : > { %2408 = shalt.err (!%p2405_p0)
}
  0x5c   : > { %2124 = dma.hbm_to_vmem [thread:$0]  (!%p2662_p5), %s3341_s0, 8192, %s2649_s12, [#allocation4], %s2497_s11, %s2497_s11, %s2498_s15  }
  0x5d   : > { %p3355_p8 = scmp.ne.s32.totalorder %s3353_s25, 0 }
  0x5e   : > { %p3356_p13 = scmp.eq.s32.totalorder (!%p3355_p8), %s2632_s16, 0 }
  0x5f   : > { %274 = sbr.rel (%p3355_p8) target bundleno = 820 (0x334), region = 40 }
  0x66   : > { %2460 = dma.done.wait (%p3356_p13), [#allocation4], 8192   ;;  %p3357_p2 = pmov %p3356_p13 }
  0x67   : > { %s280_s8 = sand.u32 1, %s2632_s16   ;;  %s282_s27 = sand.u32 1, %s2477_s19  }
  0x68   : > { %2462 = vsyncadd (%p3357_p2), [#allocation4], 4294959104  ;;  %s1969_s9 = sshll.u32 %s282_s27, 9  ;;  %s281_s26 = scalar_lea.sflag [#allocation7], %s280_s8 }
  0x69   : > { %s2727_s6 = scalar_lea.vmem [#allocation6], %s1969_s9  ;;  %p3358_p3 = scmp.ne.s32.totalorder %s3352_s17, 0 }
  0x6b   : > { %2464 = dma.done.wait (%p3358_p3), %s281_s26, 16384  }
  0x6c   : > { %2466 = vsyncadd (%p3358_p3), %s281_s26, 4294950912  ;;  %s1971_s11 = sshll.u32 %s2485_s21, 1  ;;  %s2740_s10 = scalar_lea.vmem [#allocation8], %s1969_s9 }
  0x6d   : > { %p327_p5 = scmp.lt.s32.totalorder %s1971_s11, 7  ;;  %p1972_p11 = scmp.ne.s32.totalorder %s2485_s21, 0 }
  0x6e   : > { %v2501_v0 = vmov (!%p1972_p11), 0.0  }
  0x6f   : > { %s3367_s11 = smov (!%p327_p5, %s1971_s11), 7  ;;  %336 = sbr.rel (%p1972_p11) target bundleno = 144 (0x90), region = 56 }
  0x70   : > { %s329_s12 = scalar_lea.vmem %s3343_s2, %s3367_s11  ;;  %337 = vst [vmem:[#allocation2] sm:$0xff] (!%p1972_p11), %v2501_v0  ;;  %338 = vst [vmem:[#allocation2 + $0x8] sm:$0xff] (!%p1972_p11), %v2501_v0 }
  0x71   : > { %339 = vst [vmem:[#allocation2 + $0x10] sm:$0xff] (!%p1972_p11), %v2501_v0  ;;  %340 = vst [vmem:[#allocation2 + $0x18] sm:$0xff] (!%p1972_p11), %v2501_v0 }
  0x72   : > { %341 = vst [vmem:[#allocation2 + $0x20] sm:$0xff] (!%p1972_p11), %v2501_v0  ;;  %342 = vst [vmem:[#allocation2 + $0x28] sm:$0xff] (!%p1972_p11), %v2501_v0 }
  0x73   : > { %343 = vst [vmem:[#allocation2 + $0x30] sm:$0xff] (!%p1972_p11), %v2501_v0  ;;  %344 = vst [vmem:[#allocation2 + $0x38] sm:$0xff] (!%p1972_p11), %v2501_v0 }
  0x74   : > { %345 = vst [vmem:[#allocation2 + $0x40] sm:$0xff] (!%p1972_p11), %v2501_v0  ;;  %346 = vst [vmem:[#allocation2 + $0x48] sm:$0xff] (!%p1972_p11), %v2501_v0 }
  0x75   : > { %347 = vst [vmem:[#allocation2 + $0x50] sm:$0xff] (!%p1972_p11), %v2501_v0  ;;  %348 = vst [vmem:[#allocation2 + $0x58] sm:$0xff] (!%p1972_p11), %v2501_v0 }
  0x76   : > { %349 = vst [vmem:[#allocation2 + $0x60] sm:$0xff] %v2501_v0  ;;  %350 = vst [vmem:[#allocation2 + $0x68] sm:$0xff] %v2501_v0 }
  0x77   : > { %351 = vst [vmem:[#allocation2 + $0x70] sm:$0xff] %v2501_v0  ;;  %352 = vst [vmem:[#allocation2 + $0x78] sm:$0xff] %v2501_v0 }
  0x78   : > { %353 = vst [vmem:[#allocation2 + $0x80] sm:$0xff] %v2501_v0  ;;  %354 = vst [vmem:[#allocation2 + $0x88] sm:$0xff] %v2501_v0 }
  0x79   : > { %355 = vst [vmem:[#allocation2 + $0x90] sm:$0xff] %v2501_v0  ;;  %356 = vst [vmem:[#allocation2 + $0x98] sm:$0xff] %v2501_v0 }
  0x7a   : > { %357 = vst [vmem:[#allocation2 + $0xa0] sm:$0xff] %v2501_v0  ;;  %358 = vst [vmem:[#allocation2 + $0xa8] sm:$0xff] %v2501_v0 }
  0x7b   : > { %359 = vst [vmem:[#allocation2 + $0xb0] sm:$0xff] %v2501_v0  ;;  %360 = vst [vmem:[#allocation2 + $0xb8] sm:$0xff] %v2501_v0 }
  0x7c   : > { %361 = vst [vmem:[#allocation2 + $0xc0] sm:$0xff] %v2501_v0  ;;  %362 = vst [vmem:[#allocation2 + $0xc8] sm:$0xff] %v2501_v0 }
  0x7d   : > { %363 = vst [vmem:[#allocation2 + $0xd0] sm:$0xff] %v2501_v0  ;;  %364 = vst [vmem:[#allocation2 + $0xd8] sm:$0xff] %v2501_v0 }
  0x7e   : > { %365 = vst [vmem:[#allocation2 + $0xe0] sm:$0xff] %v2501_v0  ;;  %366 = vst [vmem:[#allocation2 + $0xe8] sm:$0xff] %v2501_v0 }
  0x7f   : > { %367 = vst [vmem:[#allocation2 + $0xf0] sm:$0xff] %v2501_v0  ;;  %368 = vst [vmem:[#allocation2 + $0xf8] sm:$0xff] %v2501_v0 }
  0x80   : > { %369 = vst [vmem:[#allocation2 + $0x100] sm:$0xff] %v2501_v0  ;;  %370 = vst [vmem:[#allocation2 + $0x108] sm:$0xff] %v2501_v0 }
  0x81   : > { %371 = vst [vmem:[#allocation2 + $0x110] sm:$0xff] %v2501_v0  ;;  %372 = vst [vmem:[#allocation2 + $0x118] sm:$0xff] %v2501_v0 }
  0x82   : > { %373 = vst [vmem:[#allocation2 + $0x120] sm:$0xff] %v2501_v0  ;;  %374 = vst [vmem:[#allocation2 + $0x128] sm:$0xff] %v2501_v0 }
  0x83   : > { %375 = vst [vmem:[#allocation2 + $0x130] sm:$0xff] %v2501_v0  ;;  %376 = vst [vmem:[#allocation2 + $0x138] sm:$0xff] %v2501_v0 }
  0x84   : > { %377 = vst [vmem:[#allocation2 + $0x140] sm:$0xff] %v2501_v0  ;;  %378 = vst [vmem:[#allocation2 + $0x148] sm:$0xff] %v2501_v0 }
  0x85   : > { %379 = vst [vmem:[#allocation2 + $0x150] sm:$0xff] %v2501_v0  ;;  %380 = vst [vmem:[#allocation2 + $0x158] sm:$0xff] %v2501_v0 }
  0x86   : > { %381 = vst [vmem:[#allocation2 + $0x160] sm:$0xff] %v2501_v0  ;;  %382 = vst [vmem:[#allocation2 + $0x168] sm:$0xff] %v2501_v0 }
  0x87   : > { %383 = vst [vmem:[#allocation2 + $0x170] sm:$0xff] %v2501_v0  ;;  %384 = vst [vmem:[#allocation2 + $0x178] sm:$0xff] %v2501_v0 }
  0x88   : > { %385 = vst [vmem:[#allocation2 + $0x180] sm:$0xff] %v2501_v0  ;;  %386 = vst [vmem:[#allocation2 + $0x188] sm:$0xff] %v2501_v0 }
  0x89   : > { %387 = vst [vmem:[#allocation2 + $0x190] sm:$0xff] %v2501_v0  ;;  %388 = vst [vmem:[#allocation2 + $0x198] sm:$0xff] %v2501_v0 }
  0x8a   : > { %389 = vst [vmem:[#allocation2 + $0x1a0] sm:$0xff] %v2501_v0  ;;  %390 = vst [vmem:[#allocation2 + $0x1a8] sm:$0xff] %v2501_v0 }
  0x8b   : > { %391 = vst [vmem:[#allocation2 + $0x1b0] sm:$0xff] %v2501_v0  ;;  %392 = vst [vmem:[#allocation2 + $0x1b8] sm:$0xff] %v2501_v0 }
  0x8c   : > { %393 = vst [vmem:[#allocation2 + $0x1c0] sm:$0xff] %v2501_v0  ;;  %394 = vst [vmem:[#allocation2 + $0x1c8] sm:$0xff] %v2501_v0 }
  0x8d   : > { %395 = vst [vmem:[#allocation2 + $0x1d0] sm:$0xff] %v2501_v0  ;;  %396 = vst [vmem:[#allocation2 + $0x1d8] sm:$0xff] %v2501_v0 }
  0x8e   : > { %397 = vst [vmem:[#allocation2 + $0x1e0] sm:$0xff] %v2501_v0  ;;  %398 = vst [vmem:[#allocation2 + $0x1e8] sm:$0xff] %v2501_v0 }
  0x8f   : > { %399 = vst [vmem:[#allocation2 + $0x1f0] sm:$0xff] %v2501_v0  ;;  %400 = vst [vmem:[#allocation2 + $0x1f8] sm:$0xff] %v2501_v0 }
  0x90 PF: > { %v466_v1 = vld [vmem:[%s2727_s6 + $0x8] sm:$0xff]  ;;  %v468_v2 = vld [vmem:[%s2727_s6 + $0x18] sm:$0xff]  ;;  %v465_v3 = vld [vmem:[%s2727_s6] sm:$0xff]  ;;  %p1973_p1 = scmp.ne.s32.totalorder %s2485_s21, 3 }
  0x91   : > { %v1981_v4 = vpack.c.bf16 %v468_v2, %v466_v1  ;;  %v467_v5 = vld [vmem:[%s2727_s6 + $0x10] sm:$0xff]  ;;  %v470_v6 = vld [vmem:[%s2727_s6 + $0x28] sm:$0xff]  ;;  %v472_v7 = vld [vmem:[%s2727_s6 + $0x38] sm:$0xff] }
  0x92   : > { %v1983_v8 = vpack.c.bf16 %v467_v5, %v465_v3  ;;  %v1985_v9 = vpack.c.bf16 %v472_v7, %v470_v6  ;;  %v469_v10 = vld [vmem:[%s2727_s6 + $0x20] sm:$0xff]  ;;  %v471_v11 = vld [vmem:[%s2727_s6 + $0x30] sm:$0xff]  ;;  %v474_v12 = vld [vmem:[%s2727_s6 + $0x48] sm:$0xff] }
  0x93   : > { %1982 = vmatprep.subr.bf16.mxu0 %v1981_v4  ;;  %v476_v13 = vld [vmem:[%s2727_s6 + $0x58] sm:$0xff]  ;;  %v1987_v14 = vpack.c.bf16 %v471_v11, %v469_v10  ;;  %v473_v16 = vld [vmem:[%s2727_s6 + $0x40] sm:$0xff]  ;;  %v475_v17 = vld [vmem:[%s2727_s6 + $0x50] sm:$0xff] }
  0x94   : > { %1984 = vmatpush1.bf16.msra.mxu0 %v1983_v8  ;;  %v1989_v15 = vpack.c.bf16 %v476_v13, %v474_v12  ;;  %v478_v18 = vld [vmem:[%s2727_s6 + $0x68] sm:$0xff]  ;;  %v480_v19 = vld [vmem:[%s2727_s6 + $0x78] sm:$0xff]  ;;  %v1991_v20 = vpack.c.bf16 %v475_v17, %v473_v16  ;;  %v477_v22 = vld [vmem:[%s2727_s6 + $0x60] sm:$0xff] }
  0x95   : > { %1986 = vmatprep.subr.bf16.mxu0 %v1985_v9  ;;  %v1993_v21 = vpack.c.bf16 %v480_v19, %v478_v18  ;;  %v479_v23 = vld [vmem:[%s2727_s6 + $0x70] sm:$0xff]  ;;  %v482_v24 = vld [vmem:[%s2727_s6 + $0x88] sm:$0xff]  ;;  %v484_v25 = vld [vmem:[%s2727_s6 + $0x98] sm:$0xff] }
  0x96   : > { %v1995_v26 = vpack.c.bf16 %v479_v23, %v477_v22  ;;  %v1997_v27 = vpack.c.bf16 %v484_v25, %v482_v24  ;;  %v481_v28 = vld [vmem:[%s2727_s6 + $0x80] sm:$0xff]  ;;  %v483_v29 = vld [vmem:[%s2727_s6 + $0x90] sm:$0xff]  ;;  %v486_v30 = vld [vmem:[%s2727_s6 + $0xa8] sm:$0xff] }
  0x97   : > { %v488_v31 = vld [vmem:[%s2727_s6 + $0xb8] sm:$0xff]  ;;  %v1999_v32 = vpack.c.bf16 %v483_v29, %v481_v28  ;;  %v485_v34 = vld [vmem:[%s2727_s6 + $0xa0] sm:$0xff]  ;;  %v487_v35 = vld [vmem:[%s2727_s6 + $0xb0] sm:$0xff] }
  0x98   : > { %1988 = vmatpush1.bf16.msra.mxu0 %v1987_v14  ;;  %v2001_v33 = vpack.c.bf16 %v488_v31, %v486_v30  ;;  %v490_v36 = vld [vmem:[%s2727_s6 + $0xc8] sm:$0xff]  ;;  %v492_v37 = vld [vmem:[%s2727_s6 + $0xd8] sm:$0xff]  ;;  %v2003_v38 = vpack.c.bf16 %v487_v35, %v485_v34  ;;  %v489_v40 = vld [vmem:[%s2727_s6 + $0xc0] sm:$0xff] }
  0x99   : > { %1990 = vmatprep.subr.bf16.mxu0 %v1989_v15  ;;  %v2005_v39 = vpack.c.bf16 %v492_v37, %v490_v36  ;;  %v491_v41 = vld [vmem:[%s2727_s6 + $0xd0] sm:$0xff]  ;;  %v402_v42 = vld [vmem:[#allocation3 + $0x8] sm:$0xff]  ;;  %v496_v44 = vld [vmem:[%s2727_s6 + $0xf8] sm:$0xff] }
  0x9a   : > { %v494_v43 = vld [vmem:[%s2727_s6 + $0xe8] sm:$0xff]  ;;  %605 = vmatprep.mubr.f32.mxu0 %v402_v42  ;;  %v2007_v45 = vpack.c.bf16 %v491_v41, %v489_v40  ;;  %v493_v47 = vld [vmem:[%s2727_s6 + $0xe0] sm:$0xff]  ;;  %v495_v48 = vld [vmem:[%s2727_s6 + $0xf0] sm:$0xff] }
  0x9b   : > { %v2009_v46 = vpack.c.bf16 %v496_v44, %v494_v43  ;;  %v498_v49 = vld [vmem:[%s2727_s6 + $0x108] sm:$0xff]  ;;  %v500_v50 = vld [vmem:[%s2727_s6 + $0x118] sm:$0xff]  ;;  %v2011_v51 = vpack.c.bf16 %v495_v48, %v493_v47  ;;  %v497_v53 = vld [vmem:[%s2727_s6 + $0x100] sm:$0xff] }
  0x9c   : > { %1992 = vmatpush1.bf16.msra.mxu0 %v1991_v20  ;;  %v2013_v52 = vpack.c.bf16 %v500_v50, %v498_v49  ;;  %v499_v54 = vld [vmem:[%s2727_s6 + $0x110] sm:$0xff]  ;;  %v502_v55 = vld [vmem:[%s2727_s6 + $0x128] sm:$0xff]  ;;  %v504_v56 = vld [vmem:[%s2727_s6 + $0x138] sm:$0xff] }
  0x9d   : > { %1994 = vmatprep.subr.bf16.mxu0 %v1993_v21  ;;  %v2015_v57 = vpack.c.bf16 %v499_v54, %v497_v53  ;;  %v2017_v58 = vpack.c.bf16 %v504_v56, %v502_v55  ;;  %v501_v59 = vld [vmem:[%s2727_s6 + $0x120] sm:$0xff]  ;;  %v503_v60 = vld [vmem:[%s2727_s6 + $0x130] sm:$0xff]  ;;  %v506_v61 = vld [vmem:[%s2727_s6 + $0x148] sm:$0xff] }
  0x9e   : > { %v508_v62 = vld [vmem:[%s2727_s6 + $0x158] sm:$0xff]  ;;  %v2019_v63 = vpack.c.bf16 %v503_v60, %v501_v59  ;;  %v505_v1 = vld [vmem:[%s2727_s6 + $0x140] sm:$0xff]  ;;  %v507_v2 = vld [vmem:[%s2727_s6 + $0x150] sm:$0xff] }
  0x9f   : > { %v2021_v0 = vpack.c.bf16 %v508_v62, %v506_v61  ;;  %v510_v3 = vld [vmem:[%s2727_s6 + $0x168] sm:$0xff]  ;;  %v512_v4 = vld [vmem:[%s2727_s6 + $0x178] sm:$0xff]  ;;  %v2023_v5 = vpack.c.bf16 %v507_v2, %v505_v1  ;;  %v509_v7 = vld [vmem:[%s2727_s6 + $0x160] sm:$0xff] }
  0xa0   : > { %1996 = vmatpush1.bf16.msra.mxu0 %v1995_v26  ;;  %v2025_v6 = vpack.c.bf16 %v512_v4, %v510_v3  ;;  %v511_v8 = vld [vmem:[%s2727_s6 + $0x170] sm:$0xff]  ;;  %v514_v9 = vld [vmem:[%s2727_s6 + $0x188] sm:$0xff]  ;;  %v516_v10 = vld [vmem:[%s2727_s6 + $0x198] sm:$0xff] }
  0xa1   : > { %1998 = vmatprep.subr.bf16.mxu0 %v1997_v27  ;;  %v2027_v11 = vpack.c.bf16 %v511_v8, %v509_v7  ;;  %v2029_v12 = vpack.c.bf16 %v516_v10, %v514_v9  ;;  %v513_v13 = vld [vmem:[%s2727_s6 + $0x180] sm:$0xff]  ;;  %v515_v14 = vld [vmem:[%s2727_s6 + $0x190] sm:$0xff]  ;;  %v518_v15 = vld [vmem:[%s2727_s6 + $0x1a8] sm:$0xff] }
  0xa2   : > { %v520_v16 = vld [vmem:[%s2727_s6 + $0x1b8] sm:$0xff]  ;;  %v2031_v17 = vpack.c.bf16 %v515_v14, %v513_v13  ;;  %v517_v19 = vld [vmem:[%s2727_s6 + $0x1a0] sm:$0xff]  ;;  %v519_v20 = vld [vmem:[%s2727_s6 + $0x1b0] sm:$0xff] }
  0xa3   : > { %v2033_v18 = vpack.c.bf16 %v520_v16, %v518_v15  ;;  %v522_v21 = vld [vmem:[%s2727_s6 + $0x1c8] sm:$0xff]  ;;  %v524_v22 = vld [vmem:[%s2727_s6 + $0x1d8] sm:$0xff]  ;;  %v2035_v23 = vpack.c.bf16 %v519_v20, %v517_v19  ;;  %v521_v25 = vld [vmem:[%s2727_s6 + $0x1c0] sm:$0xff] }
  0xa4   : > { %2000 = vmatpush1.bf16.msra.mxu0 %v1999_v32  ;;  %v2037_v24 = vpack.c.bf16 %v524_v22, %v522_v21  ;;  %v523_v26 = vld [vmem:[%s2727_s6 + $0x1d0] sm:$0xff]  ;;  %v526_v27 = vld [vmem:[%s2727_s6 + $0x1e8] sm:$0xff]  ;;  %v528_v28 = vld [vmem:[%s2727_s6 + $0x1f8] sm:$0xff] }
  0xa5   : > { %2002 = vmatprep.subr.bf16.mxu0 %v2001_v33  ;;  %v2039_v29 = vpack.c.bf16 %v523_v26, %v521_v25  ;;  %v2041_v30 = vpack.c.bf16 %v528_v28, %v526_v27  ;;  %v525_v31 = vld [vmem:[%s2727_s6 + $0x1e0] sm:$0xff]  ;;  %v527_v32 = vld [vmem:[%s2727_s6 + $0x1f0] sm:$0xff]  ;;  %v404_v35 = vld [vmem:[#allocation3 + $0x18] sm:$0xff] }
  0xa6   : > { %v2043_v33 = vpack.c.bf16 %v527_v32, %v525_v31  ;;  %v401_v34 = vld [vmem:[#allocation3] sm:$0xff]  ;;  %v1183_v36 = vld [vmem:[%s2740_s10 + $0x8] sm:$0xff]  ;;  %v1185_v37 = vld [vmem:[%s2740_s10 + $0x18] sm:$0xff] }
  0xa7   : > { %v1184_v40 = vld [vmem:[%s2740_s10 + $0x10] sm:$0xff]  ;;  %v1187_v41 = vld [vmem:[%s2740_s10 + $0x28] sm:$0xff]  ;;  %v1189_v42 = vld [vmem:[%s2740_s10 + $0x38] sm:$0xff] }
  0xa8   : > { %2004 = vmatpush1.bf16.msra.mxu0 %v2003_v38  ;;  %v1182_v38 = vld [vmem:[%s2740_s10] sm:$0xff]  ;;  %v2049_v44 = vpack.c.bf16 %v1189_v42, %v1187_v41  ;;  %v1191_v47 = vld [vmem:[%s2740_s10 + $0x48] sm:$0xff]  ;;  %v1193_v48 = vld [vmem:[%s2740_s10 + $0x58] sm:$0xff] }
  0xa9   : > { %2006 = vmatprep.subr.bf16.mxu0 %v2005_v39  ;;  %v2045_v39 = vpack.c.bf16 %v1185_v37, %v1183_v36  ;;  %v2047_v43 = vpack.c.bf16 %v1184_v40, %v1182_v38  ;;  %v403_v50 = vld [vmem:[#allocation3 + $0x10] sm:$0xff]  ;;  %v406_v54 = vld [vmem:[#allocation3 + $0x28] sm:$0xff]  ;;  %v1197_v56 = vld [vmem:[%s2740_s10 + $0x78] sm:$0xff] }
  0xaa   : > { %v1192_v53 = vld [vmem:[%s2740_s10 + $0x50] sm:$0xff]  ;;  %v1195_v55 = vld [vmem:[%s2740_s10 + $0x68] sm:$0xff]  ;;  %v1194_v60 = vld [vmem:[%s2740_s10 + $0x60] sm:$0xff] }
  0xab   : > { %2046 = vmatprep.subr.bf16.mxu1 %v2045_v39  ;;  %v2057_v59 = vpack.c.bf16 %v1197_v56, %v1195_v55  ;;  %v1196_v61 = vld [vmem:[%s2740_s10 + $0x70] sm:$0xff]  ;;  %v408_v62 = vld [vmem:[#allocation3 + $0x38] sm:$0xff]  ;;  %v1198_v4 = vld [vmem:[%s2740_s10 + $0x80] sm:$0xff] }
  0xac   : > { %2008 = vmatpush1.bf16.msra.mxu0 %v2007_v45  ;;  %v1186_v45 = vld [vmem:[%s2740_s10 + $0x20] sm:$0xff]  ;;  %2048 = vmatpush1.bf16.msra.mxu1 %v2047_v43  ;;  %v2059_v1 = vpack.c.bf16 %v1196_v61, %v1194_v60  ;;  %v407_v2 = vld [vmem:[#allocation3 + $0x30] sm:$0xff]  ;;  %v1203_v7 = vld [vmem:[%s2740_s10 + $0xa8] sm:$0xff] }
  0xad   : > { %2010 = vmatprep.subr.bf16.mxu0 %v2009_v46  ;;  %v1188_v46 = vld [vmem:[%s2740_s10 + $0x30] sm:$0xff]  ;;  %2050 = vmatprep.subr.bf16.mxu1 %v2049_v44  ;;  %v1205_v8 = vld [vmem:[%s2740_s10 + $0xb8] sm:$0xff]  ;;  %v409_v10 = vld [vmem:[#allocation3 + $0x40] sm:$0xff] }
  0xae   : > { %v2051_v49 = vpack.c.bf16 %v1188_v46, %v1186_v45  ;;  %v1204_v13 = vld [vmem:[%s2740_s10 + $0xb0] sm:$0xff]  ;;  %v412_v14 = vld [vmem:[#allocation3 + $0x58] sm:$0xff]  ;;  %v1207_v15 = vld [vmem:[%s2740_s10 + $0xc8] sm:$0xff] }
  0xaf   : > { %v1209_v16 = vld [vmem:[%s2740_s10 + $0xd8] sm:$0xff]  ;;  %v1206_v20 = vld [vmem:[%s2740_s10 + $0xc0] sm:$0xff]  ;;  %v1208_v21 = vld [vmem:[%s2740_s10 + $0xd0] sm:$0xff] }
  0xb0   : > { %2012 = vmatpush1.bf16.msra.mxu0 %v2011_v51  ;;  %v2053_v51 = vpack.c.bf16 %v1193_v48, %v1191_v47  ;;  %2052 = vmatpush1.bf16.msra.mxu1 %v2051_v49  ;;  %v2069_v19 = vpack.c.bf16 %v1209_v16, %v1207_v15  ;;  %v414_v22 = vld [vmem:[#allocation3 + $0x68] sm:$0xff]  ;;  %v2071_v25 = vpack.c.bf16 %v1208_v21, %v1206_v20  ;;  %v413_v26 = vld [vmem:[#allocation3 + $0x60] sm:$0xff]  ;;  %v1217_v32 = vld [vmem:[%s2740_s10 + $0x118] sm:$0xff] }
  0xb1   : > { %2014 = vmatprep.subr.bf16.mxu0 %v2013_v52  ;;  %v1190_v52 = vld [vmem:[%s2740_s10 + $0x40] sm:$0xff]  ;;  %v1215_v31 = vld [vmem:[%s2740_s10 + $0x108] sm:$0xff]  ;;  %v1216_v37 = vld [vmem:[%s2740_s10 + $0x110] sm:$0xff] }
  0xb2   : > { %2054 = vmatprep.subr.bf16.mxu1 %v2053_v51  ;;  %v1210_v28 = vld [vmem:[%s2740_s10 + $0xe0] sm:$0xff]  ;;  %v418_v38 = vld [vmem:[#allocation3 + $0x88] sm:$0xff]  ;;  %v1221_v40 = vld [vmem:[%s2740_s10 + $0x138] sm:$0xff] }
  0xb3   : > { %v1214_v36 = vld [vmem:[%s2740_s10 + $0x100] sm:$0xff]  ;;  %v1219_v39 = vld [vmem:[%s2740_s10 + $0x128] sm:$0xff]  ;;  %v1220_v45 = vld [vmem:[%s2740_s10 + $0x130] sm:$0xff] }
  0xb4   : > { %2016 = vmatpush1.bf16.msra.mxu0 %v2015_v57  ;;  %v2055_v57 = vpack.c.bf16 %v1192_v53, %v1190_v52  ;;  %v2079_v41 = vpack.c.bf16 %v1216_v37, %v1214_v36  ;;  %v417_v42 = vld [vmem:[#allocation3 + $0x80] sm:$0xff]  ;;  %v2081_v43 = vpack.c.bf16 %v1221_v40, %v1219_v39  ;;  %v420_v46 = vld [vmem:[#allocation3 + $0x98] sm:$0xff]  ;;  %v1223_v47 = vld [vmem:[%s2740_s10 + $0x148] sm:$0xff] }
  0xb5   : > { %2018 = vmatprep.subr.bf16.mxu0 %v2017_v58  ;;  %v405_v58 = vld [vmem:[#allocation3 + $0x20] sm:$0xff]  ;;  %v1225_v48 = vld [vmem:[%s2740_s10 + $0x158] sm:$0xff]  ;;  %v1224_v53 = vld [vmem:[%s2740_s10 + $0x150] sm:$0xff] }
  0xb6   : > { %2056 = vmatpush1.bf16.msra.mxu1 %v2055_v57  ;;  %v1218_v44 = vld [vmem:[%s2740_s10 + $0x120] sm:$0xff]  ;;  %v2085_v51 = vpack.c.bf16 %v1225_v48, %v1223_v47  ;;  %v424_v57 = vld [vmem:[#allocation3 + $0xb8] sm:$0xff]  ;;  %v446_v15 = vld [vmem:[#allocation3 + $0x168] sm:$0xff] }
  0xb7   : > { %2058 = vmatprep.subr.bf16.mxu1 %v2057_v59  ;;  %v2083_v49 = vpack.c.bf16 %v1220_v45, %v1218_v44  ;;  %v1222_v52 = vld [vmem:[%s2740_s10 + $0x140] sm:$0xff]  ;;  %v426_v59 = vld [vmem:[#allocation3 + $0xc8] sm:$0xff]  ;;  %v428_v61 = vld [vmem:[#allocation3 + $0xd8] sm:$0xff] }
  0xb8   : > { %2020 = vmatpush1.bf16.msra.mxu0 %v2019_v63  ;;  %v1199_v63 = vld [vmem:[%s2740_s10 + $0x88] sm:$0xff]  ;;  %v2087_v55 = vpack.c.bf16 %v1224_v53, %v1222_v52  ;;  %v421_v56 = vld [vmem:[#allocation3 + $0xa0] sm:$0xff]  ;;  %v1228_v20 = vld [vmem:[%s2740_s10 + $0x170] sm:$0xff] }
  0xb9   : > { %2022 = vmatprep.subr.bf16.mxu0 %v2021_v0  ;;  %v1201_v0 = vld [vmem:[%s2740_s10 + $0x98] sm:$0xff]  ;;  %v425_v60 = vld [vmem:[#allocation3 + $0xc0] sm:$0xff]  ;;  %v1227_v16 = vld [vmem:[%s2740_s10 + $0x168] sm:$0xff] }
  0xba   : > { %v2061_v3 = vpack.c.bf16 %v1201_v0, %v1199_v63  ;;  %2060 = vmatpush1.bf16.msra.mxu1 %v2059_v1  ;;  %v430_v63 = vld [vmem:[#allocation3 + $0xe8] sm:$0xff]  ;;  %v429_v0 = vld [vmem:[#allocation3 + $0xe0] sm:$0xff]  ;;  %v432_v1 = vld [vmem:[#allocation3 + $0xf8] sm:$0xff] }
  0xbb   : > { %v1236_v36 = vld [vmem:[%s2740_s10 + $0x1b0] sm:$0xff]  ;;  %v452_v39 = vld [vmem:[#allocation3 + $0x198] sm:$0xff]  ;;  %v1239_v40 = vld [vmem:[%s2740_s10 + $0x1c8] sm:$0xff] }
  0xbc   : > { %2024 = vmatpush1.bf16.msra.mxu0 %v2023_v5  ;;  %v1200_v5 = vld [vmem:[%s2740_s10 + $0x90] sm:$0xff]  ;;  %2062 = vmatprep.subr.bf16.mxu1 %v2061_v3  ;;  %v434_v3 = vld [vmem:[#allocation3 + $0x108] sm:$0xff] }
  0xbd   : > { %2026 = vmatprep.subr.bf16.mxu0 %v2025_v6  ;;  %v410_v6 = vld [vmem:[#allocation3 + $0x48] sm:$0xff]  ;;  %v2063_v9 = vpack.c.bf16 %v1200_v5, %v1198_v4  ;;  %v433_v4 = vld [vmem:[#allocation3 + $0x100] sm:$0xff]  ;;  %v436_v5 = vld [vmem:[#allocation3 + $0x118] sm:$0xff] }
  0xbe   : > { %v1240_v44 = vld [vmem:[%s2740_s10 + $0x1d0] sm:$0xff]  ;;  %v454_v47 = vld [vmem:[#allocation3 + $0x1a8] sm:$0xff] }
  0xbf   : > { %2064 = vmatpush1.bf16.msra.mxu1 %v2063_v9  ;;  %v440_v9 = vld [vmem:[#allocation3 + $0x138] sm:$0xff]  ;;  %v1243_v48 = vld [vmem:[%s2740_s10 + $0x1e8] sm:$0xff]  ;;  %v1244_v52 = vld [vmem:[%s2740_s10 + $0x1f0] sm:$0xff] }
  0xc0   : > { %2028 = vmatpush1.bf16.msra.mxu0 %v2027_v11  ;;  %v2065_v11 = vpack.c.bf16 %v1205_v8, %v1203_v7  ;;  %v438_v7 = vld [vmem:[#allocation3 + $0x128] sm:$0xff]  ;;  %v437_v8 = vld [vmem:[#allocation3 + $0x120] sm:$0xff] }
  0xc1   : > { %2030 = vmatprep.subr.bf16.mxu0 %v2029_v12  ;;  %v1202_v12 = vld [vmem:[%s2740_s10 + $0xa0] sm:$0xff] }
  0xc2   : > { %2066 = vmatprep.subr.bf16.mxu1 %v2065_v11  ;;  %v442_v11 = vld [vmem:[#allocation3 + $0x148] sm:$0xff] }
  0xc4   : > { %2032 = vmatpush1.bf16.msra.mxu0 %v2031_v17  ;;  %v2067_v17 = vpack.c.bf16 %v1204_v13, %v1202_v12  ;;  %v441_v12 = vld [vmem:[#allocation3 + $0x140] sm:$0xff]  ;;  %v444_v13 = vld [vmem:[#allocation3 + $0x158] sm:$0xff] }
  0xc5   : > { %2034 = vmatprep.subr.bf16.mxu0 %v2033_v18  ;;  %v411_v18 = vld [vmem:[#allocation3 + $0x50] sm:$0xff] }
  0xc6   : > { %2068 = vmatpush1.bf16.msra.mxu1 %v2067_v17  ;;  %v1229_v17 = vld [vmem:[%s2740_s10 + $0x178] sm:$0xff] }
  0xc7   : > { %2070 = vmatprep.subr.bf16.mxu1 %v2069_v19  ;;  %v1226_v19 = vld [vmem:[%s2740_s10 + $0x160] sm:$0xff] }
  0xc8   : > { %2036 = vmatpush1.bf16.msra.mxu0 %v2035_v23  ;;  %v1211_v23 = vld [vmem:[%s2740_s10 + $0xe8] sm:$0xff]  ;;  %v2091_v21 = vpack.c.bf16 %v1228_v20, %v1226_v19 }
  0xc9   : > { %2038 = vmatprep.subr.bf16.mxu0 %v2037_v24  ;;  %v1213_v24 = vld [vmem:[%s2740_s10 + $0xf8] sm:$0xff] }
  0xca   : > { %v2073_v27 = vpack.c.bf16 %v1213_v24, %v1211_v23  ;;  %2072 = vmatpush1.bf16.msra.mxu1 %v2071_v25  ;;  %v448_v23 = vld [vmem:[#allocation3 + $0x178] sm:$0xff]  ;;  %v1231_v24 = vld [vmem:[%s2740_s10 + $0x188] sm:$0xff] }
  0xcb   : > { %v1233_v25 = vld [vmem:[%s2740_s10 + $0x198] sm:$0xff] }
  0xcc   : > { %2040 = vmatpush1.bf16.msra.mxu0 %v2039_v29  ;;  %v1212_v29 = vld [vmem:[%s2740_s10 + $0xf0] sm:$0xff]  ;;  %2074 = vmatprep.subr.bf16.mxu1 %v2073_v27  ;;  %v1230_v27 = vld [vmem:[%s2740_s10 + $0x180] sm:$0xff] }
  0xcd   : > { %2042 = vmatprep.subr.bf16.mxu0 %v2041_v30  ;;  %v416_v30 = vld [vmem:[#allocation3 + $0x78] sm:$0xff] }
  0xd0   : > { %2044 = vmatpush1.bf16.msra.mxu0 %v2043_v33  ;;  %v2075_v33 = vpack.c.bf16 %v1212_v29, %v1210_v28  ;;  %v1232_v28 = vld [vmem:[%s2740_s10 + $0x190] sm:$0xff] }
  0xd1   : > { %v2095_v29 = vpack.c.bf16 %v1232_v28, %v1230_v27 }
  0xd2   : > { %2076 = vmatpush1.bf16.msra.mxu1 %v2075_v33  ;;  %v1237_v33 = vld [vmem:[%s2740_s10 + $0x1b8] sm:$0xff] }
  0xd3   : > { %606 = vmatmul.mubr.f32.vlgmr.msra.gmra.mrb[0].mxu0 %v401_v34  ;;  %v415_v34 = vld [vmem:[#allocation3 + $0x70] sm:$0xff] }
  0xd4   : > { %611 = vmatprep.mubr.f32.mxu0 %v404_v35  ;;  %v2077_v35 = vpack.c.bf16 %v1217_v32, %v1215_v31  ;;  %v450_v31 = vld [vmem:[#allocation3 + $0x188] sm:$0xff] }
  0xd5   : > { %v1235_v32 = vld [vmem:[%s2740_s10 + $0x1a8] sm:$0xff] }
  0xd6   : > { %2078 = vmatprep.subr.bf16.mxu1 %v2077_v35  ;;  %v1234_v35 = vld [vmem:[%s2740_s10 + $0x1a0] sm:$0xff] }
  0xd7   : > { %612 = vmatmul.mubr.f32.gmra.mrb[2].mxu0 %v403_v50  ;;  %2080 = vmatpush1.bf16.msra.mxu1 %v2079_v41  ;;  %v419_v50 = vld [vmem:[#allocation3 + $0x90] sm:$0xff]  ;;  %v2099_v37 = vpack.c.bf16 %v1236_v36, %v1234_v35  ;;  %v1241_v41 = vld [vmem:[%s2740_s10 + $0x1d8] sm:$0xff] }
  0xd8   : > { %617 = vmatprep.mubr.f32.mxu0 %v406_v54  ;;  %2082 = vmatprep.subr.bf16.mxu1 %v2081_v43  ;;  %v422_v54 = vld [vmem:[#allocation3 + $0xa8] sm:$0xff]  ;;  %v1238_v43 = vld [vmem:[%s2740_s10 + $0x1c0] sm:$0xff] }
  0xd9   : > { %v2103_v45 = vpack.c.bf16 %v1240_v44, %v1238_v43 }
  0xdb   : > { %618 = vmatmul.mubr.f32.gmra.mrb[4].mxu0 %v405_v58  ;;  %2084 = vmatpush1.bf16.msra.mxu1 %v2083_v49  ;;  %v423_v58 = vld [vmem:[#allocation3 + $0xb0] sm:$0xff]  ;;  %v1245_v49 = vld [vmem:[%s2740_s10 + $0x1f8] sm:$0xff] }
  0xdc   : > { %623 = vmatprep.mubr.f32.mxu0 %v408_v62  ;;  %2086 = vmatprep.subr.bf16.mxu1 %v2085_v51  ;;  %v427_v62 = vld [vmem:[#allocation3 + $0xd0] sm:$0xff]  ;;  %v1242_v51 = vld [vmem:[%s2740_s10 + $0x1e0] sm:$0xff] }
  0xdd   : > { %v2107_v53 = vpack.c.bf16 %v1244_v52, %v1242_v51 }
  0xdf   : > { %624 = vmatmul.mubr.f32.gmra.mrb[6].mxu0 %v407_v2  ;;  %2088 = vmatpush1.bf16.msra.mxu1 %v2087_v55  ;;  %v431_v2 = vld [vmem:[#allocation3 + $0xf0] sm:$0xff]  ;;  %v456_v55 = vld [vmem:[#allocation3 + $0x1b8] sm:$0xff] }
  0xe0   : > { %629 = vmatprep.mubr.f32.mxu0 %v410_v6  ;;  %v435_v6 = vld [vmem:[#allocation3 + $0x110] sm:$0xff] }
  0xe3   : > { %630 = vmatmul.mubr.f32.gmra.mrb[8].mxu0 %v409_v10  ;;  %v439_v10 = vld [vmem:[#allocation3 + $0x130] sm:$0xff] }
  0xe4   : > { %635 = vmatprep.mubr.f32.mxu0 %v412_v14  ;;  %v443_v14 = vld [vmem:[#allocation3 + $0x150] sm:$0xff] }
  0xe7   : > { %636 = vmatmul.mubr.f32.gmra.mrb[10].mxu0 %v411_v18  ;;  %v2089_v18 = vpack.c.bf16 %v1229_v17, %v1227_v16 }
  0xe8   : > { %641 = vmatprep.mubr.f32.mxu0 %v414_v22  ;;  %v445_v22 = vld [vmem:[#allocation3 + $0x160] sm:$0xff] }
  0xe9   : > { %2090 = vmatprep.subr.bf16.mxu1 %v2089_v18 }
  0xea   : > { %2092 = vmatpush1.bf16.msra.mxu1 %v2091_v21 }
  0xeb   : > { %642 = vmatmul.mubr.f32.gmra.mrb[12].mxu0 %v413_v26  ;;  %v2093_v26 = vpack.c.bf16 %v1233_v25, %v1231_v24 }
  0xec   : > { %647 = vmatprep.mubr.f32.mxu0 %v416_v30  ;;  %v447_v30 = vld [vmem:[#allocation3 + $0x170] sm:$0xff] }
  0xed   : > { %2094 = vmatprep.subr.bf16.mxu1 %v2093_v26 }
  0xee   : > { %2096 = vmatpush1.bf16.msra.mxu1 %v2095_v29 }
  0xef   : > { %648 = vmatmul.mubr.f32.gmra.mrb[14].mxu0 %v415_v34  ;;  %v2097_v34 = vpack.c.bf16 %v1237_v33, %v1235_v32 }
  0xf0   : > { %653 = vmatprep.mubr.f32.mxu0 %v418_v38  ;;  %v449_v38 = vld [vmem:[#allocation3 + $0x180] sm:$0xff] }
  0xf1   : > { %2098 = vmatprep.subr.bf16.mxu1 %v2097_v34 }
  0xf2   : > { %2100 = vmatpush1.bf16.msra.mxu1 %v2099_v37 }
  0xf3   : > { %654 = vmatmul.mubr.f32.gmra.mrb[16].mxu0 %v417_v42  ;;  %v2101_v42 = vpack.c.bf16 %v1241_v41, %v1239_v40 }
  0xf4   : > { %659 = vmatprep.mubr.f32.mxu0 %v420_v46  ;;  %v451_v46 = vld [vmem:[#allocation3 + $0x190] sm:$0xff] }
  0xf5   : > { %2102 = vmatprep.subr.bf16.mxu1 %v2101_v42 }
  0xf6   : > { %2104 = vmatpush1.bf16.msra.mxu1 %v2103_v45 }
  0xf7   : > { %660 = vmatmul.mubr.f32.gmra.mrb[18].mxu0 %v419_v50  ;;  %v2105_v50 = vpack.c.bf16 %v1245_v49, %v1243_v48 }
  0xf8   : > { %665 = vmatprep.mubr.f32.mxu0 %v422_v54  ;;  %v453_v54 = vld [vmem:[#allocation3 + $0x1a0] sm:$0xff] }
  0xf9   : > { %2106 = vmatprep.subr.bf16.mxu1 %v2105_v50 }
  0xfa   : > { %2108 = vmatpush1.bf16.msra.mxu1 %v2107_v53 }
  0xfb   : > { %666 = vmatmul.mubr.f32.gmra.mrb[20].mxu0 %v421_v56  ;;  %v455_v56 = vld [vmem:[#allocation3 + $0x1b0] sm:$0xff] }
  0xfc   : > { %671 = vmatprep.mubr.f32.mxu0 %v424_v57  ;;  %v458_v57 = vld [vmem:[#allocation3 + $0x1c8] sm:$0xff] }
  0xff   : > { %672 = vmatmul.mubr.f32.gmra.mrb[22].mxu0 %v423_v58  ;;  %v457_v58 = vld [vmem:[#allocation3 + $0x1c0] sm:$0xff] }
 0x100   : > { %677 = vmatprep.mubr.f32.mxu0 %v426_v59  ;;  %v460_v59 = vld [vmem:[#allocation3 + $0x1d8] sm:$0xff] }
 0x103   : > { %678 = vmatmul.mubr.f32.gmra.mrb[24].mxu0 %v425_v60  ;;  %v459_v60 = vld [vmem:[#allocation3 + $0x1d0] sm:$0xff] }
 0x104   : > { %683 = vmatprep.mubr.f32.mxu0 %v428_v61  ;;  %v462_v61 = vld [vmem:[#allocation3 + $0x1e8] sm:$0xff] }
 0x107   : > { %684 = vmatmul.mubr.f32.gmra.mrb[26].mxu0 %v427_v62  ;;  %v461_v62 = vld [vmem:[#allocation3 + $0x1e0] sm:$0xff] }
 0x108   : > { %689 = vmatprep.mubr.f32.mxu0 %v430_v63  ;;  %v464_v63 = vld [vmem:[#allocation3 + $0x1f8] sm:$0xff] }
 0x10b   : > { %690 = vmatmul.mubr.f32.gmra.mrb[28].mxu0 %v429_v0  ;;  %v463_v0 = vld [vmem:[#allocation3 + $0x1f0] sm:$0xff] }
 0x10c   : > { %695 = vmatprep.mubr.f32.mxu0 %v432_v1  ;;  %v531_v1 = vlaneseq }
 0x10f   : > { %696 = vmatmul.mubr.f32.gmra.mrb[30].mxu0 %v431_v2  ;;  %v2935_v2 = vshrl.u32 %v531_v1, 7 }
 0x110   : > { %701 = vmatprep.mubr.f32.mxu0 %v434_v3 }
 0x111   : > { %v533_v3 = vsub.s32 0, %v2935_v2 }
 0x113   : > { %702 = vmatmul.mubr.f32.gmra.mrb[32].mxu0 %v433_v4  ;;  %v529_v4 = vld [vmem:[%s329_s12] sm:$0x3] }
 0x114   : > { %707 = vmatprep.mubr.f32.mxu0 %v436_v5  ;;  %v537_v5 = vsub.s32 1, %v2935_v2 }
 0x117   : > { %708 = vmatmul.mubr.f32.gmra.mrb[34].mxu0 %v435_v6  ;;  %v2946_v6 = vrot.slane %v529_v4, %v533_v3 }
 0x118   : > { %713 = vmatprep.mubr.f32.mxu0 %v438_v7  ;;  %v2950_v7 = vrot.slane %v529_v4, %v537_v5 }
 0x11b   : > { %714 = vmatmul.mubr.f32.gmra.mrb[36].mxu0 %v437_v8 }
 0x11c   : > { %719 = vmatprep.mubr.f32.mxu0 %v440_v9 }
 0x11f   : > { %720 = vmatmul.mubr.f32.gmra.mrb[38].mxu0 %v439_v10 }
 0x120   : > { %725 = vmatprep.mubr.f32.mxu0 %v442_v11 }
 0x123   : > { %726 = vmatmul.mubr.f32.gmra.mrb[40].mxu0 %v441_v12 }
 0x124   : > { %731 = vmatprep.mubr.f32.mxu0 %v444_v13 }
 0x127   : > { %732 = vmatmul.mubr.f32.gmra.mrb[42].mxu0 %v443_v14 }
 0x128   : > { %737 = vmatprep.mubr.f32.mxu0 %v446_v15 }
 0x12b   : > { %738 = vmatmul.mubr.f32.gmra.mrb[44].mxu0 %v445_v22 }
 0x12c   : > { %743 = vmatprep.mubr.f32.mxu0 %v448_v23 }
 0x12f   : > { %744 = vmatmul.mubr.f32.gmra.mrb[46].mxu0 %v447_v30 }
 0x130   : > { %749 = vmatprep.mubr.f32.mxu0 %v450_v31 }
 0x133   : > { %750 = vmatmul.mubr.f32.gmra.mrb[48].mxu0 %v449_v38 }
 0x134   : > { %755 = vmatprep.mubr.f32.mxu0 %v452_v39 }
 0x137   : > { %756 = vmatmul.mubr.f32.gmra.mrb[50].mxu0 %v451_v46 }
 0x138   : > { %761 = vmatprep.mubr.f32.mxu0 %v454_v47 }
 0x13b   : > { %762 = vmatmul.mubr.f32.gmra.mrb[52].mxu0 %v453_v54 }
 0x13c   : > { %767 = vmatprep.mubr.f32.mxu0 %v456_v55 }
 0x13f   : > { %768 = vmatmul.mubr.f32.gmra.mrb[54].mxu0 %v455_v56 }
 0x140   : > { %773 = vmatprep.mubr.f32.mxu0 %v458_v57 }
 0x143   : > { %774 = vmatmul.mubr.f32.gmra.mrb[56].mxu0 %v457_v58 }
 0x144   : > { %779 = vmatprep.mubr.f32.mxu0 %v460_v59 }
 0x147   : > { %780 = vmatmul.mubr.f32.gmra.mrb[58].mxu0 %v459_v60 }
 0x148   : > { %785 = vmatprep.mubr.f32.mxu0 %v462_v61 }
 0x14b   : > { %786 = vmatmul.mubr.f32.gmra.mrb[60].mxu0 %v461_v62 }
 0x14c   : > { %791 = vmatprep.mubr.f32.mxu0 %v464_v63 }
 0x14f   : > { %792 = vmatmul.mubr.f32.gmra.mrb[62].mxu0 %v463_v0 }
 0x1a6   : > { %v607_v8 = vpop.f32.mrb[0].mxu0 }
 0x1a7   : > { %v608_v9 = vadd.f32 %v607_v8, %v2946_v6  ;;  %v609_v10 = vpop.f32.mrb[1].mxu0 }
 0x1a8   : > { %v610_v11 = vadd.f32 %v609_v10, %v2950_v7 }
 0x1a9   : > { %v862_v12 = vmul.f32 0.70710677, %v608_v9  ;;  %v798_v40 = vmul.f32 0.5, %v608_v9 }
 0x1aa   : > { %v863_v13 = vmul.f32 0.70710677, %v610_v11  ;;  %v613_v14 = vpop.f32.mrb[2].mxu0  ;;  %v799_v38 = vmul.f32 0.5, %v610_v11 }
 0x1ab   : > { %2193 = verf.f32 %v862_v12  ;;  %v614_v15 = vadd.f32 %v613_v14, %v2946_v6  ;;  %v615_v16 = vpop.f32.mrb[3].mxu0 }
 0x1ac   : > { %2195 = verf.f32 %v863_v13  ;;  %v616_v17 = vadd.f32 %v615_v16, %v2950_v7 }
 0x1ad   : > { %v864_v18 = vmul.f32 0.70710677, %v614_v15  ;;  %v800_v54 = vmul.f32 0.5, %v614_v15 }
 0x1ae   : > { %v865_v19 = vmul.f32 0.70710677, %v616_v17  ;;  %v619_v20 = vpop.f32.mrb[4].mxu0  ;;  %v801_v50 = vmul.f32 0.5, %v616_v17 }
 0x1af   : > { %2197 = verf.f32 %v864_v18  ;;  %v620_v21 = vadd.f32 %v619_v20, %v2946_v6  ;;  %v621_v22 = vpop.f32.mrb[5].mxu0 }
 0x1b0   : > { %2199 = verf.f32 %v865_v19  ;;  %v622_v23 = vadd.f32 %v621_v22, %v2950_v7 }
 0x1b1   : > { %v866_v24 = vmul.f32 0.70710677, %v620_v21  ;;  %v802_v9 = vmul.f32 0.5, %v620_v21 }
 0x1b2   : > { %v867_v25 = vmul.f32 0.70710677, %v622_v23  ;;  %v625_v26 = vpop.f32.mrb[6].mxu0  ;;  %v803_v0 = vmul.f32 0.5, %v622_v23 }
 0x1b3   : > { %2201 = verf.f32 %v866_v24  ;;  %v2959_v27 = vadd.f32 %v625_v26, %v2946_v6  ;;  %v627_v28 = vpop.f32.mrb[7].mxu0 }
 0x1b4   : > { %2203 = verf.f32 %v867_v25  ;;  %v628_v29 = vadd.f32 %v627_v28, %v2950_v7 }
 0x1b5   : > { %v2194_v30 = vpop.eup %2193  ;;  %v868_v31 = vmul.f32 0.70710677, %v2959_v27  ;;  %v804_v23 = vmul.f32 0.5, %v2959_v27 }
 0x1b6   : > { %v2196_v32 = vpop.eup %2195  ;;  %v990_v33 = vadd.f32 1.0, %v2194_v30  ;;  %v869_v34 = vmul.f32 0.70710677, %v628_v29  ;;  %v631_v35 = vpop.f32.mrb[8].mxu0  ;;  %v805_v19 = vmul.f32 0.5, %v628_v29 }
 0x1b7   : > { %2205 = verf.f32 %v868_v31  ;;  %v2964_v36 = vadd.f32 %v631_v35, %v2946_v6  ;;  %v633_v37 = vpop.f32.mrb[9].mxu0  ;;  %v991_v39 = vadd.f32 1.0, %v2196_v32 }
 0x1b8   : > { %2207 = verf.f32 %v869_v34  ;;  %v2967_v41 = vadd.f32 %v633_v37, %v2950_v7  ;;  %v1054_v49 = vmul.f32 %v990_v33, %v798_v40 }
 0x1b9   : > { %v2198_v42 = vpop.eup %2197  ;;  %v870_v43 = vmul.f32 0.70710677, %v2964_v36  ;;  %v1055_v44 = vmul.f32 %v991_v39, %v799_v38  ;;  %v806_v38 = vmul.f32 0.5, %v2964_v36 }
 0x1ba   : > { %v2200_v45 = vpop.eup %2199  ;;  %v992_v46 = vadd.f32 1.0, %v2198_v42  ;;  %v871_v47 = vmul.f32 0.70710677, %v2967_v41  ;;  %v637_v48 = vpop.f32.mrb[10].mxu0  ;;  %v807_v34 = vmul.f32 0.5, %v2967_v41 }
 0x1bb   : > { %v993_v51 = vadd.f32 1.0, %v2200_v45  ;;  %2209 = verf.f32 %v870_v43  ;;  %v2972_v52 = vadd.f32 %v637_v48, %v2946_v6  ;;  %v639_v53 = vpop.f32.mrb[11].mxu0  ;;  %1310 = vmatprep.mubr.f32.mxu1 %v1055_v44 }
 0x1bc   : > { %2211 = verf.f32 %v871_v47  ;;  %v2975_v55 = vadd.f32 %v639_v53, %v2950_v7  ;;  %1311 = vmatmul.mubr.f32.vlgmr.msra.gmra.mrb[0].mxu1 %v1054_v49  ;;  %v1056_v63 = vmul.f32 %v992_v46, %v800_v54 }
 0x1bd   : > { %v2202_v56 = vpop.eup %2201  ;;  %v872_v57 = vmul.f32 0.70710677, %v2972_v52  ;;  %v1057_v58 = vmul.f32 %v993_v51, %v801_v50  ;;  %v808_v51 = vmul.f32 0.5, %v2972_v52 }
 0x1be   : > { %v2204_v59 = vpop.eup %2203  ;;  %v994_v60 = vadd.f32 1.0, %v2202_v56  ;;  %v873_v61 = vmul.f32 0.70710677, %v2975_v55  ;;  %v643_v62 = vpop.f32.mrb[12].mxu0  ;;  %v809_v48 = vmul.f32 0.5, %v2975_v55 }
 0x1bf   : > { %v995_v1 = vadd.f32 1.0, %v2204_v59  ;;  %2213 = verf.f32 %v872_v57  ;;  %v2980_v4 = vadd.f32 %v643_v62, %v2946_v6  ;;  %v645_v8 = vpop.f32.mrb[13].mxu0  ;;  %1316 = vmatprep.mubr.f32.mxu1 %v1057_v58 }
 0x1c0   : > { %2215 = verf.f32 %v873_v61  ;;  %v2983_v10 = vadd.f32 %v645_v8, %v2950_v7  ;;  %1317 = vmatmul.mubr.f32.gmra.mrb[2].mxu1 %v1056_v63  ;;  %v1058_v18 = vmul.f32 %v994_v60, %v802_v9 }
 0x1c1   : > { %v2206_v11 = vpop.eup %2205  ;;  %v874_v12 = vmul.f32 0.70710677, %v2980_v4  ;;  %v1059_v13 = vmul.f32 %v995_v1, %v803_v0  ;;  %v810_v1 = vmul.f32 0.5, %v2980_v4 }
 0x1c2   : > { %v2208_v14 = vpop.eup %2207  ;;  %v996_v15 = vadd.f32 1.0, %v2206_v11  ;;  %v875_v16 = vmul.f32 0.70710677, %v2983_v10  ;;  %v649_v17 = vpop.f32.mrb[14].mxu0  ;;  %v811_v62 = vmul.f32 0.5, %v2983_v10 }
 0x1c3   : > { %v997_v20 = vadd.f32 1.0, %v2208_v14  ;;  %2217 = verf.f32 %v874_v12  ;;  %v2988_v21 = vadd.f32 %v649_v17, %v2946_v6  ;;  %v651_v22 = vpop.f32.mrb[15].mxu0  ;;  %1322 = vmatprep.mubr.f32.mxu1 %v1059_v13 }
 0x1c4   : > { %2219 = verf.f32 %v875_v16  ;;  %v2992_v24 = vadd.f32 %v651_v22, %v2950_v7  ;;  %1323 = vmatmul.mubr.f32.gmra.mrb[4].mxu1 %v1058_v18  ;;  %v1060_v33 = vmul.f32 %v996_v15, %v804_v23 }
 0x1c5   : > { %v2210_v25 = vpop.eup %2209  ;;  %v876_v26 = vmul.f32 0.70710677, %v2988_v21  ;;  %v1061_v28 = vmul.f32 %v997_v20, %v805_v19  ;;  %v812_v20 = vmul.f32 0.5, %v2988_v21 }
 0x1c6   : > { %v2212_v30 = vpop.eup %2211  ;;  %v998_v29 = vadd.f32 1.0, %v2210_v25  ;;  %v877_v31 = vmul.f32 0.70710677, %v2992_v24  ;;  %v655_v32 = vpop.f32.mrb[16].mxu0  ;;  %v813_v17 = vmul.f32 0.5, %v2992_v24 }
 0x1c7   : > { %v999_v35 = vadd.f32 1.0, %v2212_v30  ;;  %2221 = verf.f32 %v876_v26  ;;  %v2998_v27 = vadd.f32 %v655_v32, %v2946_v6  ;;  %v657_v37 = vpop.f32.mrb[17].mxu0  ;;  %1328 = vmatprep.mubr.f32.mxu1 %v1061_v28 }
 0x1c8   : > { %2223 = verf.f32 %v877_v31  ;;  %v3002_v39 = vadd.f32 %v657_v37, %v2950_v7  ;;  %1329 = vmatmul.mubr.f32.gmra.mrb[6].mxu1 %v1060_v33  ;;  %v1062_v47 = vmul.f32 %v998_v29, %v806_v38 }
 0x1c9   : > { %v2214_v40 = vpop.eup %2213  ;;  %v878_v42 = vmul.f32 0.70710677, %v2998_v27  ;;  %v1063_v43 = vmul.f32 %v999_v35, %v807_v34  ;;  %v814_v35 = vmul.f32 0.5, %v2998_v27 }
 0x1ca   : > { %v2216_v44 = vpop.eup %2215  ;;  %v1000_v41 = vadd.f32 1.0, %v2214_v40  ;;  %v879_v45 = vmul.f32 0.70710677, %v3002_v39  ;;  %v661_v46 = vpop.f32.mrb[18].mxu0  ;;  %v815_v32 = vmul.f32 0.5, %v3002_v39 }
 0x1cb   : > { %v1001_v49 = vadd.f32 1.0, %v2216_v44  ;;  %2225 = verf.f32 %v878_v42  ;;  %v3008_v36 = vadd.f32 %v661_v46, %v2946_v6  ;;  %v663_v50 = vpop.f32.mrb[19].mxu0  ;;  %1334 = vmatprep.mubr.f32.mxu1 %v1063_v43 }
 0x1cc   : > { %2227 = verf.f32 %v879_v45  ;;  %v3012_v53 = vadd.f32 %v663_v50, %v2950_v7  ;;  %1335 = vmatmul.mubr.f32.gmra.mrb[8].mxu1 %v1062_v47  ;;  %v1064_v61 = vmul.f32 %v1000_v41, %v808_v51 }
 0x1cd   : > { %v2218_v54 = vpop.eup %2217  ;;  %v880_v56 = vmul.f32 0.70710677, %v3008_v36  ;;  %v1065_v57 = vmul.f32 %v1001_v49, %v809_v48  ;;  %v816_v49 = vmul.f32 0.5, %v3008_v36 }
 0x1ce   : > { %v2220_v58 = vpop.eup %2219  ;;  %v1002_v55 = vadd.f32 1.0, %v2218_v54  ;;  %v881_v59 = vmul.f32 0.70710677, %v3012_v53  ;;  %v667_v60 = vpop.f32.mrb[20].mxu0  ;;  %v817_v46 = vmul.f32 0.5, %v3012_v53 }
 0x1cf   : > { %v1003_v63 = vadd.f32 1.0, %v2220_v58  ;;  %2229 = verf.f32 %v880_v56  ;;  %v3018_v52 = vadd.f32 %v667_v60, %v2946_v6  ;;  %v669_v0 = vpop.f32.mrb[21].mxu0  ;;  %1340 = vmatprep.mubr.f32.mxu1 %v1065_v57 }
 0x1d0   : > { %2231 = verf.f32 %v881_v59  ;;  %v3022_v8 = vadd.f32 %v669_v0, %v2950_v7  ;;  %1341 = vmatmul.mubr.f32.gmra.mrb[10].mxu1 %v1064_v61  ;;  %v1066_v16 = vmul.f32 %v1002_v55, %v810_v1 }
 0x1d1   : > { %v2222_v9 = vpop.eup %2221  ;;  %v882_v11 = vmul.f32 0.70710677, %v3018_v52  ;;  %v1067_v12 = vmul.f32 %v1003_v63, %v811_v62  ;;  %v818_v63 = vmul.f32 0.5, %v3018_v52 }
 0x1d2   : > { %v2224_v13 = vpop.eup %2223  ;;  %v1004_v10 = vadd.f32 1.0, %v2222_v9  ;;  %v883_v14 = vmul.f32 0.70710677, %v3022_v8  ;;  %v673_v15 = vpop.f32.mrb[22].mxu0  ;;  %v819_v60 = vmul.f32 0.5, %v3022_v8 }
 0x1d3   : > { %v1005_v18 = vadd.f32 1.0, %v2224_v13  ;;  %2233 = verf.f32 %v882_v11  ;;  %v3028_v4 = vadd.f32 %v673_v15, %v2946_v6  ;;  %v675_v19 = vpop.f32.mrb[23].mxu0  ;;  %1346 = vmatprep.mubr.f32.mxu1 %v1067_v12 }
 0x1d4   : > { %2235 = verf.f32 %v883_v14  ;;  %v3032_v22 = vadd.f32 %v675_v19, %v2950_v7  ;;  %1347 = vmatmul.mubr.f32.gmra.mrb[12].mxu1 %v1066_v16  ;;  %v1068_v31 = vmul.f32 %v1004_v10, %v812_v20 }
 0x1d5   : > { %v2226_v23 = vpop.eup %2225  ;;  %v884_v25 = vmul.f32 0.70710677, %v3028_v4  ;;  %v1069_v26 = vmul.f32 %v1005_v18, %v813_v17  ;;  %v820_v18 = vmul.f32 0.5, %v3028_v4 }
 0x1d6   : > { %v2228_v28 = vpop.eup %2227  ;;  %v1006_v24 = vadd.f32 1.0, %v2226_v23  ;;  %v885_v30 = vmul.f32 0.70710677, %v3032_v22  ;;  %v679_v29 = vpop.f32.mrb[24].mxu0  ;;  %v821_v15 = vmul.f32 0.5, %v3032_v22 }
 0x1d7   : > { %v1007_v33 = vadd.f32 1.0, %v2228_v28  ;;  %2237 = verf.f32 %v884_v25  ;;  %v3038_v21 = vadd.f32 %v679_v29, %v2946_v6  ;;  %v681_v34 = vpop.f32.mrb[25].mxu0  ;;  %1352 = vmatprep.mubr.f32.mxu1 %v1069_v26 }
 0x1d8   : > { %2239 = verf.f32 %v885_v30  ;;  %v3042_v37 = vadd.f32 %v681_v34, %v2950_v7  ;;  %1353 = vmatmul.mubr.f32.gmra.mrb[14].mxu1 %v1068_v31  ;;  %v1070_v45 = vmul.f32 %v1006_v24, %v814_v35 }
 0x1d9   : > { %v2230_v38 = vpop.eup %2229  ;;  %v886_v40 = vmul.f32 0.70710677, %v3038_v21  ;;  %v1071_v42 = vmul.f32 %v1007_v33, %v815_v32  ;;  %v822_v33 = vmul.f32 0.5, %v3038_v21 }
 0x1da   : > { %v2232_v43 = vpop.eup %2231  ;;  %v1008_v39 = vadd.f32 1.0, %v2230_v38  ;;  %v887_v44 = vmul.f32 0.70710677, %v3042_v37  ;;  %v685_v41 = vpop.f32.mrb[26].mxu0  ;;  %v823_v29 = vmul.f32 0.5, %v3042_v37 }
 0x1db   : > { %v1009_v47 = vadd.f32 1.0, %v2232_v43  ;;  %2241 = verf.f32 %v886_v40  ;;  %v3048_v27 = vadd.f32 %v685_v41, %v2946_v6  ;;  %v687_v48 = vpop.f32.mrb[27].mxu0  ;;  %1358 = vmatprep.mubr.f32.mxu1 %v1071_v42 }
 0x1dc   : > { %2243 = verf.f32 %v887_v44  ;;  %v3052_v50 = vadd.f32 %v687_v48, %v2950_v7  ;;  %1359 = vmatmul.mubr.f32.gmra.mrb[16].mxu1 %v1070_v45  ;;  %v1072_v59 = vmul.f32 %v1008_v39, %v816_v49 }
 0x1dd   : > { %v2234_v51 = vpop.eup %2233  ;;  %v888_v54 = vmul.f32 0.70710677, %v3048_v27  ;;  %v1073_v56 = vmul.f32 %v1009_v47, %v817_v46  ;;  %v824_v47 = vmul.f32 0.5, %v3048_v27 }
 0x1de   : > { %v2236_v57 = vpop.eup %2235  ;;  %v1010_v53 = vadd.f32 1.0, %v2234_v51  ;;  %v889_v58 = vmul.f32 0.70710677, %v3052_v50  ;;  %v691_v55 = vpop.f32.mrb[28].mxu0  ;;  %v825_v41 = vmul.f32 0.5, %v3052_v50 }
 0x1df   : > { %v1011_v61 = vadd.f32 1.0, %v2236_v57  ;;  %2245 = verf.f32 %v888_v54  ;;  %v3058_v36 = vadd.f32 %v691_v55, %v2946_v6  ;;  %v693_v62 = vpop.f32.mrb[29].mxu0  ;;  %1364 = vmatprep.mubr.f32.mxu1 %v1073_v56 }
 0x1e0   : > { %2247 = verf.f32 %v889_v58  ;;  %v3062_v0 = vadd.f32 %v693_v62, %v2950_v7  ;;  %1365 = vmatmul.mubr.f32.gmra.mrb[18].mxu1 %v1072_v59  ;;  %v1074_v14 = vmul.f32 %v1010_v53, %v818_v63 }
 0x1e1   : > { %v2238_v1 = vpop.eup %2237  ;;  %v890_v9 = vmul.f32 0.70710677, %v3058_v36  ;;  %v1075_v11 = vmul.f32 %v1011_v61, %v819_v60  ;;  %v826_v61 = vmul.f32 0.5, %v3058_v36 }
 0x1e2   : > { %v2240_v12 = vpop.eup %2239  ;;  %v1012_v8 = vadd.f32 1.0, %v2238_v1  ;;  %v891_v13 = vmul.f32 0.70710677, %v3062_v0  ;;  %v697_v10 = vpop.f32.mrb[30].mxu0  ;;  %v827_v55 = vmul.f32 0.5, %v3062_v0 }
 0x1e3   : > { %v1013_v16 = vadd.f32 1.0, %v2240_v12  ;;  %2249 = verf.f32 %v890_v9  ;;  %v3068_v52 = vadd.f32 %v697_v10, %v2946_v6  ;;  %v699_v17 = vpop.f32.mrb[31].mxu0  ;;  %1370 = vmatprep.mubr.f32.mxu1 %v1075_v11 }
 0x1e4   : > { %2251 = verf.f32 %v891_v13  ;;  %v3072_v19 = vadd.f32 %v699_v17, %v2950_v7  ;;  %1371 = vmatmul.mubr.f32.gmra.mrb[20].mxu1 %v1074_v14  ;;  %v1076_v30 = vmul.f32 %v1012_v8, %v820_v18 }
 0x1e5   : > { %v2242_v20 = vpop.eup %2241  ;;  %v892_v23 = vmul.f32 0.70710677, %v3068_v52  ;;  %v1077_v25 = vmul.f32 %v1013_v16, %v821_v15  ;;  %v828_v16 = vmul.f32 0.5, %v3068_v52 }
 0x1e6   : > { %v2244_v26 = vpop.eup %2243  ;;  %v1014_v22 = vadd.f32 1.0, %v2242_v20  ;;  %v893_v28 = vmul.f32 0.70710677, %v3072_v19  ;;  %v703_v24 = vpop.f32.mrb[32].mxu0  ;;  %v829_v10 = vmul.f32 0.5, %v3072_v19 }
 0x1e7   : > { %v1015_v31 = vadd.f32 1.0, %v2244_v26  ;;  %2253 = verf.f32 %v892_v23  ;;  %v3078_v4 = vadd.f32 %v703_v24, %v2946_v6  ;;  %v705_v32 = vpop.f32.mrb[33].mxu0  ;;  %1376 = vmatprep.mubr.f32.mxu1 %v1077_v25 }
 0x1e8   : > { %2255 = verf.f32 %v893_v28  ;;  %v3082_v34 = vadd.f32 %v705_v32, %v2950_v7  ;;  %1377 = vmatmul.mubr.f32.gmra.mrb[22].mxu1 %v1076_v30  ;;  %v1078_v44 = vmul.f32 %v1014_v22, %v822_v33 }
 0x1e9   : > { %v2246_v35 = vpop.eup %2245  ;;  %v894_v38 = vmul.f32 0.70710677, %v3078_v4  ;;  %v1079_v40 = vmul.f32 %v1015_v31, %v823_v29  ;;  %v830_v31 = vmul.f32 0.5, %v3078_v4 }
 0x1ea   : > { %v2248_v42 = vpop.eup %2247  ;;  %v1016_v37 = vadd.f32 1.0, %v2246_v35  ;;  %v895_v43 = vmul.f32 0.70710677, %v3082_v34  ;;  %v709_v39 = vpop.f32.mrb[34].mxu0  ;;  %v831_v24 = vmul.f32 0.5, %v3082_v34 }
 0x1eb   : > { %v1017_v45 = vadd.f32 1.0, %v2248_v42  ;;  %2257 = verf.f32 %v894_v38  ;;  %v3088_v21 = vadd.f32 %v709_v39, %v2946_v6  ;;  %v711_v46 = vpop.f32.mrb[35].mxu0  ;;  %1382 = vmatprep.mubr.f32.mxu1 %v1079_v40 }
 0x1ec   : > { %2259 = verf.f32 %v895_v43  ;;  %v3092_v48 = vadd.f32 %v711_v46, %v2950_v7  ;;  %1383 = vmatmul.mubr.f32.gmra.mrb[24].mxu1 %v1078_v44  ;;  %v1080_v58 = vmul.f32 %v1016_v37, %v824_v47 }
 0x1ed   : > { %v2250_v49 = vpop.eup %2249  ;;  %v896_v51 = vmul.f32 0.70710677, %v3088_v21  ;;  %v1081_v54 = vmul.f32 %v1017_v45, %v825_v41  ;;  %v832_v45 = vmul.f32 0.5, %v3088_v21 }
 0x1ee   : > { %v2252_v56 = vpop.eup %2251  ;;  %v1018_v50 = vadd.f32 1.0, %v2250_v49  ;;  %v897_v57 = vmul.f32 0.70710677, %v3092_v48  ;;  %v715_v53 = vpop.f32.mrb[36].mxu0  ;;  %v833_v39 = vmul.f32 0.5, %v3092_v48 }
 0x1ef   : > { %v1019_v59 = vadd.f32 1.0, %v2252_v56  ;;  %2261 = verf.f32 %v896_v51  ;;  %v3098_v27 = vadd.f32 %v715_v53, %v2946_v6  ;;  %v717_v60 = vpop.f32.mrb[37].mxu0  ;;  %1388 = vmatprep.mubr.f32.mxu1 %v1081_v54 }
 0x1f0   : > { %2263 = verf.f32 %v897_v57  ;;  %v3102_v62 = vadd.f32 %v717_v60, %v2950_v7  ;;  %1389 = vmatmul.mubr.f32.gmra.mrb[26].mxu1 %v1080_v58  ;;  %v1082_v13 = vmul.f32 %v1018_v50, %v826_v61 }
 0x1f1   : > { %v2254_v63 = vpop.eup %2253  ;;  %v898_v1 = vmul.f32 0.70710677, %v3098_v27  ;;  %v1083_v9 = vmul.f32 %v1019_v59, %v827_v55  ;;  %v834_v59 = vmul.f32 0.5, %v3098_v27 }
 0x1f2   : > { %v2256_v11 = vpop.eup %2255  ;;  %v1020_v0 = vadd.f32 1.0, %v2254_v63  ;;  %v899_v12 = vmul.f32 0.70710677, %v3102_v62  ;;  %v721_v8 = vpop.f32.mrb[38].mxu0  ;;  %v835_v53 = vmul.f32 0.5, %v3102_v62 }
 0x1f3   : > { %v1021_v14 = vadd.f32 1.0, %v2256_v11  ;;  %2265 = verf.f32 %v898_v1  ;;  %v3108_v36 = vadd.f32 %v721_v8, %v2946_v6  ;;  %v723_v15 = vpop.f32.mrb[39].mxu0  ;;  %1394 = vmatprep.mubr.f32.mxu1 %v1083_v9 }
 0x1f4   : > { %2267 = verf.f32 %v899_v12  ;;  %v3112_v17 = vadd.f32 %v723_v15, %v2950_v7  ;;  %1395 = vmatmul.mubr.f32.gmra.mrb[28].mxu1 %v1082_v13  ;;  %v1084_v28 = vmul.f32 %v1020_v0, %v828_v16 }
 0x1f5   : > { %v2258_v18 = vpop.eup %2257  ;;  %v900_v20 = vmul.f32 0.70710677, %v3108_v36  ;;  %v1085_v23 = vmul.f32 %v1021_v14, %v829_v10  ;;  %v836_v14 = vmul.f32 0.5, %v3108_v36 }
 0x1f6   : > { %v2260_v25 = vpop.eup %2259  ;;  %v1022_v19 = vadd.f32 1.0, %v2258_v18  ;;  %v901_v26 = vmul.f32 0.70710677, %v3112_v17  ;;  %v727_v22 = vpop.f32.mrb[40].mxu0  ;;  %v837_v8 = vmul.f32 0.5, %v3112_v17 }
 0x1f7   : > { %v1023_v30 = vadd.f32 1.0, %v2260_v25  ;;  %2269 = verf.f32 %v900_v20  ;;  %v3118_v52 = vadd.f32 %v727_v22, %v2946_v6  ;;  %v729_v29 = vpop.f32.mrb[41].mxu0  ;;  %1400 = vmatprep.mubr.f32.mxu1 %v1085_v23 }
 0x1f8   : > { %2271 = verf.f32 %v901_v26  ;;  %v3122_v32 = vadd.f32 %v729_v29, %v2950_v7  ;;  %1401 = vmatmul.mubr.f32.gmra.mrb[30].mxu1 %v1084_v28  ;;  %v1086_v43 = vmul.f32 %v1022_v19, %v830_v31 }
 0x1f9   : > { %v2262_v33 = vpop.eup %2261  ;;  %v902_v35 = vmul.f32 0.70710677, %v3118_v52  ;;  %v1087_v38 = vmul.f32 %v1023_v30, %v831_v24  ;;  %v838_v30 = vmul.f32 0.5, %v3118_v52 }
 0x1fa   : > { %v2264_v40 = vpop.eup %2263  ;;  %v1024_v34 = vadd.f32 1.0, %v2262_v33  ;;  %v903_v42 = vmul.f32 0.70710677, %v3122_v32  ;;  %v733_v37 = vpop.f32.mrb[42].mxu0  ;;  %v839_v22 = vmul.f32 0.5, %v3122_v32 }
 0x1fb   : > { %v1025_v44 = vadd.f32 1.0, %v2264_v40  ;;  %2273 = verf.f32 %v902_v35  ;;  %v3128_v4 = vadd.f32 %v733_v37, %v2946_v6  ;;  %v735_v41 = vpop.f32.mrb[43].mxu0  ;;  %1406 = vmatprep.mubr.f32.mxu1 %v1087_v38 }
 0x1fc   : > { %2275 = verf.f32 %v903_v42  ;;  %v3132_v46 = vadd.f32 %v735_v41, %v2950_v7  ;;  %1407 = vmatmul.mubr.f32.gmra.mrb[32].mxu1 %v1086_v43  ;;  %v1088_v57 = vmul.f32 %v1024_v34, %v832_v45 }
 0x1fd   : > { %v2266_v47 = vpop.eup %2265  ;;  %v904_v49 = vmul.f32 0.70710677, %v3128_v4  ;;  %v1089_v51 = vmul.f32 %v1025_v44, %v833_v39  ;;  %v840_v44 = vmul.f32 0.5, %v3128_v4 }
 0x1fe   : > { %v2268_v54 = vpop.eup %2267  ;;  %v1026_v48 = vadd.f32 1.0, %v2266_v47  ;;  %v905_v56 = vmul.f32 0.70710677, %v3132_v46  ;;  %v739_v50 = vpop.f32.mrb[44].mxu0  ;;  %v841_v37 = vmul.f32 0.5, %v3132_v46 }
 0x1ff   : > { %v1027_v58 = vadd.f32 1.0, %v2268_v54  ;;  %2277 = verf.f32 %v904_v49  ;;  %v3138_v21 = vadd.f32 %v739_v50, %v2946_v6  ;;  %v741_v55 = vpop.f32.mrb[45].mxu0  ;;  %1412 = vmatprep.mubr.f32.mxu1 %v1089_v51 }
 0x200   : > { %2279 = verf.f32 %v905_v56  ;;  %v3142_v60 = vadd.f32 %v741_v55, %v2950_v7  ;;  %1413 = vmatmul.mubr.f32.gmra.mrb[34].mxu1 %v1088_v57  ;;  %v1090_v12 = vmul.f32 %v1026_v48, %v834_v59 }
 0x201   : > { %v2270_v61 = vpop.eup %2269  ;;  %v906_v63 = vmul.f32 0.70710677, %v3138_v21  ;;  %v1091_v1 = vmul.f32 %v1027_v58, %v835_v53  ;;  %v842_v58 = vmul.f32 0.5, %v3138_v21 }
 0x202   : > { %v2272_v9 = vpop.eup %2271  ;;  %v1028_v62 = vadd.f32 1.0, %v2270_v61  ;;  %v907_v11 = vmul.f32 0.70710677, %v3142_v60  ;;  %v745_v0 = vpop.f32.mrb[46].mxu0  ;;  %v843_v50 = vmul.f32 0.5, %v3142_v60 }
 0x203   : > { %v1029_v13 = vadd.f32 1.0, %v2272_v9  ;;  %2281 = verf.f32 %v906_v63  ;;  %v3148_v27 = vadd.f32 %v745_v0, %v2946_v6  ;;  %v747_v10 = vpop.f32.mrb[47].mxu0  ;;  %1418 = vmatprep.mubr.f32.mxu1 %v1091_v1 }
 0x204   : > { %2283 = verf.f32 %v907_v11  ;;  %v3152_v15 = vadd.f32 %v747_v10, %v2950_v7  ;;  %1419 = vmatmul.mubr.f32.gmra.mrb[36].mxu1 %v1090_v12  ;;  %v1092_v26 = vmul.f32 %v1028_v62, %v836_v14 }
 0x205   : > { %v2274_v16 = vpop.eup %2273  ;;  %v908_v18 = vmul.f32 0.70710677, %v3148_v27  ;;  %v1093_v20 = vmul.f32 %v1029_v13, %v837_v8  ;;  %v844_v13 = vmul.f32 0.5, %v3148_v27 }
 0x206   : > { %v2276_v23 = vpop.eup %2275  ;;  %v1030_v17 = vadd.f32 1.0, %v2274_v16  ;;  %v909_v25 = vmul.f32 0.70710677, %v3152_v15  ;;  %v751_v19 = vpop.f32.mrb[48].mxu0  ;;  %v845_v0 = vmul.f32 0.5, %v3152_v15 }
 0x207   : > { %v1031_v28 = vadd.f32 1.0, %v2276_v23  ;;  %2285 = verf.f32 %v908_v18  ;;  %v3158_v36 = vadd.f32 %v751_v19, %v2946_v6  ;;  %v753_v24 = vpop.f32.mrb[49].mxu0  ;;  %1424 = vmatprep.mubr.f32.mxu1 %v1093_v20 }
 0x208   : > { %2287 = verf.f32 %v909_v25  ;;  %v3162_v29 = vadd.f32 %v753_v24, %v2950_v7  ;;  %1425 = vmatmul.mubr.f32.gmra.mrb[38].mxu1 %v1092_v26  ;;  %v1094_v42 = vmul.f32 %v1030_v17, %v838_v30 }
 0x209   : > { %v2278_v31 = vpop.eup %2277  ;;  %v910_v33 = vmul.f32 0.70710677, %v3158_v36  ;;  %v1095_v35 = vmul.f32 %v1031_v28, %v839_v22  ;;  %v846_v28 = vmul.f32 0.5, %v3158_v36 }
 0x20a   : > { %v2280_v38 = vpop.eup %2279  ;;  %v1032_v32 = vadd.f32 1.0, %v2278_v31  ;;  %v911_v40 = vmul.f32 0.70710677, %v3162_v29  ;;  %v757_v34 = vpop.f32.mrb[50].mxu0  ;;  %v847_v19 = vmul.f32 0.5, %v3162_v29 }
 0x20b   : > { %v1033_v43 = vadd.f32 1.0, %v2280_v38  ;;  %2289 = verf.f32 %v910_v33  ;;  %v3168_v52 = vadd.f32 %v757_v34, %v2946_v6  ;;  %v759_v39 = vpop.f32.mrb[51].mxu0  ;;  %1430 = vmatprep.mubr.f32.mxu1 %v1095_v35 }
 0x20c   : > { %2291 = verf.f32 %v911_v40  ;;  %v3172_v41 = vadd.f32 %v759_v39, %v2950_v7  ;;  %1431 = vmatmul.mubr.f32.gmra.mrb[40].mxu1 %v1094_v42  ;;  %v1096_v56 = vmul.f32 %v1032_v32, %v840_v44 }
 0x20d   : > { %v2282_v45 = vpop.eup %2281  ;;  %v912_v47 = vmul.f32 0.70710677, %v3168_v52  ;;  %v1097_v49 = vmul.f32 %v1033_v43, %v841_v37  ;;  %v848_v43 = vmul.f32 0.5, %v3168_v52 }
 0x20e   : > { %v2284_v51 = vpop.eup %2283  ;;  %v1034_v46 = vadd.f32 1.0, %v2282_v45  ;;  %v913_v54 = vmul.f32 0.70710677, %v3172_v41  ;;  %v763_v48 = vpop.f32.mrb[52].mxu0  ;;  %v849_v34 = vmul.f32 0.5, %v3172_v41 }
 0x20f   : > { %v1035_v57 = vadd.f32 1.0, %v2284_v51  ;;  %2293 = verf.f32 %v912_v47  ;;  %v3178_v4 = vadd.f32 %v763_v48, %v2946_v6  ;;  %v765_v53 = vpop.f32.mrb[53].mxu0  ;;  %1436 = vmatprep.mubr.f32.mxu1 %v1097_v49 }
 0x210   : > { %2295 = verf.f32 %v913_v54  ;;  %v3182_v55 = vadd.f32 %v765_v53, %v2950_v7  ;;  %1437 = vmatmul.mubr.f32.gmra.mrb[42].mxu1 %v1096_v56  ;;  %v1098_v11 = vmul.f32 %v1034_v46, %v842_v58 }
 0x211   : > { %v2286_v59 = vpop.eup %2285  ;;  %v914_v61 = vmul.f32 0.70710677, %v3178_v4  ;;  %v1099_v63 = vmul.f32 %v1035_v57, %v843_v50  ;;  %v850_v57 = vmul.f32 0.5, %v3178_v4 }
 0x212   : > { %v2288_v1 = vpop.eup %2287  ;;  %v1036_v60 = vadd.f32 1.0, %v2286_v59  ;;  %v915_v9 = vmul.f32 0.70710677, %v3182_v55  ;;  %v769_v62 = vpop.f32.mrb[54].mxu0  ;;  %v851_v48 = vmul.f32 0.5, %v3182_v55 }
 0x213   : > { %v1037_v12 = vadd.f32 1.0, %v2288_v1  ;;  %2297 = verf.f32 %v914_v61  ;;  %v3188_v21 = vadd.f32 %v769_v62, %v2946_v6  ;;  %v771_v8 = vpop.f32.mrb[55].mxu0  ;;  %1442 = vmatprep.mubr.f32.mxu1 %v1099_v63 }
 0x214   : > { %2299 = verf.f32 %v915_v9  ;;  %v3192_v10 = vadd.f32 %v771_v8, %v2950_v7  ;;  %1443 = vmatmul.mubr.f32.gmra.mrb[44].mxu1 %v1098_v11  ;;  %v1100_v25 = vmul.f32 %v1036_v60, %v844_v13 }
 0x215   : > { %v2290_v14 = vpop.eup %2289  ;;  %v916_v16 = vmul.f32 0.70710677, %v3188_v21  ;;  %v1101_v18 = vmul.f32 %v1037_v12, %v845_v0  ;;  %v852_v4 = vmul.f32 0.5, %v3188_v21 }
 0x216   : > { %v2292_v20 = vpop.eup %2291  ;;  %v1038_v15 = vadd.f32 1.0, %v2290_v14  ;;  %v917_v23 = vmul.f32 0.70710677, %v3192_v10  ;;  %v775_v17 = vpop.f32.mrb[56].mxu0  ;;  %v853_v62 = vmul.f32 0.5, %v3192_v10 }
 0x217   : > { %v1039_v26 = vadd.f32 1.0, %v2292_v20  ;;  %2301 = verf.f32 %v916_v16  ;;  %v3198_v27 = vadd.f32 %v775_v17, %v2946_v6  ;;  %v777_v22 = vpop.f32.mrb[57].mxu0  ;;  %1448 = vmatprep.mubr.f32.mxu1 %v1101_v18 }
 0x218   : > { %2303 = verf.f32 %v917_v23  ;;  %v3202_v24 = vadd.f32 %v777_v22, %v2950_v7  ;;  %1449 = vmatmul.mubr.f32.gmra.mrb[46].mxu1 %v1100_v25  ;;  %v1102_v40 = vmul.f32 %v1038_v15, %v846_v28 }
 0x219   : > { %v2294_v30 = vpop.eup %2293  ;;  %v918_v31 = vmul.f32 0.70710677, %v3198_v27  ;;  %v1103_v33 = vmul.f32 %v1039_v26, %v847_v19 }
 0x21a   : > { %v2296_v35 = vpop.eup %2295  ;;  %v1040_v29 = vadd.f32 1.0, %v2294_v30  ;;  %v919_v38 = vmul.f32 0.70710677, %v3202_v24  ;;  %v781_v32 = vpop.f32.mrb[58].mxu0  ;;  %v855_v10 = vmul.f32 0.5, %v3202_v24 }
 0x21b   : > { %v1041_v42 = vadd.f32 1.0, %v2296_v35  ;;  %2305 = verf.f32 %v918_v31  ;;  %v3208_v36 = vadd.f32 %v781_v32, %v2946_v6  ;;  %v783_v37 = vpop.f32.mrb[59].mxu0  ;;  %1454 = vmatprep.mubr.f32.mxu1 %v1103_v33 }
 0x21c   : > { %2307 = verf.f32 %v919_v38  ;;  %v784_v39 = vadd.f32 %v783_v37, %v2950_v7  ;;  %1455 = vmatmul.mubr.f32.gmra.mrb[48].mxu1 %v1102_v40  ;;  %v1104_v54 = vmul.f32 %v1040_v29, %v848_v43 }
 0x21d   : > { %v2298_v44 = vpop.eup %2297  ;;  %v920_v45 = vmul.f32 0.70710677, %v3208_v36  ;;  %v1105_v47 = vmul.f32 %v1041_v42, %v849_v34  ;;  %v856_v30 = vmul.f32 0.5, %v3208_v36 }
 0x21e   : > { %v2300_v49 = vpop.eup %2299  ;;  %v1042_v51 = vadd.f32 1.0, %v2298_v44  ;;  %v921_v41 = vmul.f32 0.70710677, %v784_v39  ;;  %v787_v46 = vpop.f32.mrb[60].mxu0  ;;  %v857_v22 = vmul.f32 0.5, %v784_v39 }
 0x21f   : > { %v1043_v56 = vadd.f32 1.0, %v2300_v49  ;;  %2309 = verf.f32 %v920_v45  ;;  %v788_v50 = vadd.f32 %v787_v46, %v2946_v6  ;;  %v789_v52 = vpop.f32.mrb[61].mxu0  ;;  %1460 = vmatprep.mubr.f32.mxu1 %v1105_v47  ;;  %v1118_v49 = vld [vmem:[#allocation2] sm:$0xff] }
 0x220   : > { %2311 = verf.f32 %v921_v41  ;;  %v790_v53 = vadd.f32 %v789_v52, %v2950_v7  ;;  %1461 = vmatmul.mubr.f32.gmra.mrb[50].mxu1 %v1104_v54  ;;  %v1106_v55 = vmul.f32 %v1042_v51, %v850_v57  ;;  %v1119_v51 = vld [vmem:[#allocation2 + $0x8] sm:$0xff] }
 0x221   : > { %v2302_v58 = vpop.eup %2301  ;;  %v922_v59 = vmul.f32 0.70710677, %v788_v50  ;;  %v1107_v61 = vmul.f32 %v1043_v56, %v851_v48  ;;  %v858_v32 = vmul.f32 0.5, %v788_v50  ;;  %v1120_v56 = vld [vmem:[#allocation2 + $0x10] sm:$0xff]  ;;  %v1121_v50 = vld [vmem:[#allocation2 + $0x18] sm:$0xff] }
 0x222   : > { %v2304_v63 = vpop.eup %2303  ;;  %v1044_v1 = vadd.f32 1.0, %v2302_v58  ;;  %v923_v60 = vmul.f32 0.70710677, %v790_v53  ;;  %v793_v9 = vpop.f32.mrb[62].mxu0  ;;  %v859_v38 = vmul.f32 0.5, %v790_v53 }
 0x223   : > { %v1045_v11 = vadd.f32 1.0, %v2304_v63  ;;  %2313 = verf.f32 %v922_v59  ;;  %v794_v0 = vadd.f32 %v793_v9, %v2946_v6  ;;  %v795_v12 = vpop.f32.mrb[63].mxu0  ;;  %1466 = vmatprep.mubr.f32.mxu1 %v1107_v61  ;;  %v854_v6 = vmul.f32 0.5, %v3198_v27  ;;  %v1122_v59 = vld [vmem:[#allocation2 + $0x20] sm:$0xff]  ;;  %v1123_v61 = vld [vmem:[#allocation2 + $0x28] sm:$0xff] }
 0x224   : > { %2315 = verf.f32 %v923_v60  ;;  %v796_v8 = vadd.f32 %v795_v12, %v2950_v7  ;;  %1467 = vmatmul.mubr.f32.gmra.mrb[52].mxu1 %v1106_v55  ;;  %v1108_v23 = vmul.f32 %v1044_v1, %v852_v4  ;;  %v1124_v55 = vld [vmem:[#allocation2 + $0x30] sm:$0xff] }
 0x225   : > { %v2306_v13 = vpop.eup %2305  ;;  %v924_v14 = vmul.f32 0.70710677, %v794_v0  ;;  %v1109_v16 = vmul.f32 %v1045_v11, %v853_v62  ;;  %v860_v36 = vmul.f32 0.5, %v794_v0  ;;  %v1125_v62 = vld [vmem:[#allocation2 + $0x38] sm:$0xff] }
 0x226   : > { %v2308_v18 = vpop.eup %2307  ;;  %v1046_v20 = vadd.f32 1.0, %v2306_v13  ;;  %v925_v15 = vmul.f32 0.70710677, %v796_v8  ;;  %v861_v39 = vmul.f32 0.5, %v796_v8  ;;  %v1126_v8 = vld [vmem:[#allocation2 + $0x40] sm:$0xff]  ;;  %v1127_v13 = vld [vmem:[#allocation2 + $0x48] sm:$0xff] }
 0x227   : > { %v1047_v17 = vadd.f32 1.0, %v2308_v18  ;;  %2317 = verf.f32 %v924_v14  ;;  %1472 = vmatprep.mubr.f32.mxu1 %v1109_v16 }
 0x228   : > { %2319 = verf.f32 %v925_v15  ;;  %1473 = vmatmul.mubr.f32.gmra.mrb[54].mxu1 %v1108_v23  ;;  %v1110_v26 = vmul.f32 %v1046_v20, %v854_v6  ;;  %v1128_v15 = vld [vmem:[#allocation2 + $0x50] sm:$0xff]  ;;  %v1129_v23 = vld [vmem:[#allocation2 + $0x58] sm:$0xff] }
 0x229   : > { %v2310_v21 = vpop.eup %2309  ;;  %v1111_v25 = vmul.f32 %v1047_v17, %v855_v10 }
 0x22a   : > { %v2312_v7 = vpop.eup %2311  ;;  %v1048_v19 = vadd.f32 1.0, %v2310_v21 }
 0x22b   : > { %v1049_v28 = vadd.f32 1.0, %v2312_v7  ;;  %1478 = vmatprep.mubr.f32.mxu1 %v1111_v25  ;;  %v1130_v25 = vld [vmem:[#allocation2 + $0x60] sm:$0xff]  ;;  %v1131_v7 = vld [vmem:[#allocation2 + $0x68] sm:$0xff] }
 0x22c   : > { %1479 = vmatmul.mubr.f32.gmra.mrb[56].mxu1 %v1110_v26  ;;  %v1112_v29 = vmul.f32 %v1048_v19, %v856_v30  ;;  %v1132_v30 = vld [vmem:[#allocation2 + $0x70] sm:$0xff] }
 0x22d   : > { %v2314_v31 = vpop.eup %2313  ;;  %v1113_v24 = vmul.f32 %v1049_v28, %v857_v22 }
 0x22e   : > { %v2316_v33 = vpop.eup %2315  ;;  %v1050_v35 = vadd.f32 1.0, %v2314_v31  ;;  %v1133_v31 = vld [vmem:[#allocation2 + $0x78] sm:$0xff] }
 0x22f   : > { %v1051_v27 = vadd.f32 1.0, %v2316_v33  ;;  %1484 = vmatprep.mubr.f32.mxu1 %v1113_v24 }
 0x230   : > { %1485 = vmatmul.mubr.f32.gmra.mrb[58].mxu1 %v1112_v29  ;;  %v1114_v43 = vmul.f32 %v1050_v35, %v858_v32 }
 0x231   : > { %v2318_v40 = vpop.eup %2317  ;;  %v1115_v34 = vmul.f32 %v1051_v27, %v859_v38  ;;  %v1134_v38 = vld [vmem:[#allocation2 + $0x80] sm:$0xff]  ;;  %v1135_v27 = vld [vmem:[#allocation2 + $0x88] sm:$0xff] }
 0x232   : > { %v2320_v42 = vpop.eup %2319  ;;  %v1052_v37 = vadd.f32 1.0, %v2318_v40 }
 0x233   : > { %v1053_v44 = vadd.f32 1.0, %v2320_v42  ;;  %1490 = vmatprep.mubr.f32.mxu1 %v1115_v34 }
 0x234   : > { %1491 = vmatmul.mubr.f32.gmra.mrb[60].mxu1 %v1114_v43  ;;  %v1116_v47 = vmul.f32 %v1052_v37, %v860_v36  ;;  %v1136_v37 = vld [vmem:[#allocation2 + $0x90] sm:$0xff]  ;;  %v1137_v43 = vld [vmem:[#allocation2 + $0x98] sm:$0xff] }
 0x235   : > { %v1117_v45 = vmul.f32 %v1053_v44, %v861_v39 }
 0x237   : > { %1496 = vmatprep.mubr.f32.mxu1 %v1117_v45 }
 0x238   : > { %1497 = vmatmul.mubr.f32.gmra.mrb[62].mxu1 %v1116_v47  ;;  %v1138_v47 = vld [vmem:[#allocation2 + $0xa0] sm:$0xff] }
 0x28f   : > { %v1312_v41 = vpop.f32.mrb[0].mxu1 }
 0x290   : > { %v1503_v46 = vadd.f32 %v1312_v41, %v1118_v49  ;;  %v1314_v54 = vpop.f32.mrb[1].mxu1  ;;  %v1139_v49 = vld [vmem:[#allocation2 + $0xa8] sm:$0xff] }
 0x291   : > { %v1504_v48 = vadd.f32 %v1314_v54, %v1119_v51 }
 0x292   : > { %1567 = vst [vmem:[#allocation2] sm:$0xff] %v1503_v46 }
 0x293   : > { %1568 = vst [vmem:[#allocation2 + $0x8] sm:$0xff] %v1504_v48  ;;  %v1318_v52 = vpop.f32.mrb[2].mxu1  ;;  %v1140_v48 = vld [vmem:[#allocation2 + $0xb0] sm:$0xff] }
 0x294   : > { %v1505_v57 = vadd.f32 %v1318_v52, %v1120_v56  ;;  %v1320_v53 = vpop.f32.mrb[3].mxu1  ;;  %v1141_v56 = vld [vmem:[#allocation2 + $0xb8] sm:$0xff] }
 0x295   : > { %v1506_v58 = vadd.f32 %v1320_v53, %v1121_v50 }
 0x296   : > { %1569 = vst [vmem:[#allocation2 + $0x10] sm:$0xff] %v1505_v57 }
 0x297   : > { %1570 = vst [vmem:[#allocation2 + $0x18] sm:$0xff] %v1506_v58  ;;  %v1324_v63 = vpop.f32.mrb[4].mxu1  ;;  %v1142_v58 = vld [vmem:[#allocation2 + $0xc0] sm:$0xff] }
 0x298   : > { %v1507_v1 = vadd.f32 %v1324_v63, %v1122_v59  ;;  %v1326_v60 = vpop.f32.mrb[5].mxu1  ;;  %v1143_v59 = vld [vmem:[#allocation2 + $0xc8] sm:$0xff] }
 0x299   : > { %v1508_v9 = vadd.f32 %v1326_v60, %v1123_v61 }
 0x29a   : > { %1571 = vst [vmem:[#allocation2 + $0x20] sm:$0xff] %v1507_v1 }
 0x29b   : > { %1572 = vst [vmem:[#allocation2 + $0x28] sm:$0xff] %v1508_v9  ;;  %v1330_v11 = vpop.f32.mrb[6].mxu1  ;;  %v1144_v9 = vld [vmem:[#allocation2 + $0xd0] sm:$0xff] }
 0x29c   : > { %v1509_v0 = vadd.f32 %v1330_v11, %v1124_v55  ;;  %v1332_v12 = vpop.f32.mrb[7].mxu1  ;;  %v1145_v55 = vld [vmem:[#allocation2 + $0xd8] sm:$0xff] }
 0x29d   : > { %v1510_v4 = vadd.f32 %v1332_v12, %v1125_v62 }
 0x29e   : > { %1573 = vst [vmem:[#allocation2 + $0x30] sm:$0xff] %v1509_v0 }
 0x29f   : > { %1574 = vst [vmem:[#allocation2 + $0x38] sm:$0xff] %v1510_v4  ;;  %v1336_v14 = vpop.f32.mrb[8].mxu1  ;;  %v1146_v4 = vld [vmem:[#allocation2 + $0xe0] sm:$0xff] }
 0x2a0   : > { %v1511_v16 = vadd.f32 %v1336_v14, %v1126_v8  ;;  %v1338_v18 = vpop.f32.mrb[9].mxu1  ;;  %v1147_v8 = vld [vmem:[#allocation2 + $0xe8] sm:$0xff] }
 0x2a1   : > { %v1512_v20 = vadd.f32 %v1338_v18, %v1127_v13 }
 0x2a2   : > { %1575 = vst [vmem:[#allocation2 + $0x40] sm:$0xff] %v1511_v16 }
 0x2a3   : > { %1576 = vst [vmem:[#allocation2 + $0x48] sm:$0xff] %v1512_v20  ;;  %v1342_v10 = vpop.f32.mrb[10].mxu1  ;;  %v1148_v20 = vld [vmem:[#allocation2 + $0xf0] sm:$0xff] }
 0x2a4   : > { %v1513_v17 = vadd.f32 %v1342_v10, %v1128_v15  ;;  %v1344_v6 = vpop.f32.mrb[11].mxu1  ;;  %v1149_v15 = vld [vmem:[#allocation2 + $0xf8] sm:$0xff] }
 0x2a5   : > { %v1514_v21 = vadd.f32 %v1344_v6, %v1129_v23 }
 0x2a6   : > { %1577 = vst [vmem:[#allocation2 + $0x50] sm:$0xff] %v1513_v17 }
 0x2a7   : > { %1578 = vst [vmem:[#allocation2 + $0x58] sm:$0xff] %v1514_v21  ;;  %v1348_v19 = vpop.f32.mrb[12].mxu1  ;;  %v1150_v21 = vld [vmem:[#allocation2 + $0x100] sm:$0xff] }
 0x2a8   : > { %v1515_v26 = vadd.f32 %v1348_v19, %v1130_v25  ;;  %v1350_v22 = vpop.f32.mrb[13].mxu1  ;;  %v1151_v25 = vld [vmem:[#allocation2 + $0x108] sm:$0xff] }
 0x2a9   : > { %v1516_v28 = vadd.f32 %v1350_v22, %v1131_v7 }
 0x2aa   : > { %1579 = vst [vmem:[#allocation2 + $0x60] sm:$0xff] %v1515_v26 }
 0x2ab   : > { %1580 = vst [vmem:[#allocation2 + $0x68] sm:$0xff] %v1516_v28  ;;  %v1354_v24 = vpop.f32.mrb[14].mxu1  ;;  %v1152_v28 = vld [vmem:[#allocation2 + $0x110] sm:$0xff] }
 0x2ac   : > { %v1517_v33 = vadd.f32 %v1354_v24, %v1132_v30  ;;  %v1356_v35 = vpop.f32.mrb[15].mxu1  ;;  %v1153_v30 = vld [vmem:[#allocation2 + $0x118] sm:$0xff] }
 0x2ad   : > { %v1518_v29 = vadd.f32 %v1356_v35, %v1133_v31 }
 0x2ae   : > { %1581 = vst [vmem:[#allocation2 + $0x70] sm:$0xff] %v1517_v33 }
 0x2af   : > { %1582 = vst [vmem:[#allocation2 + $0x78] sm:$0xff] %v1518_v29  ;;  %v1360_v32 = vpop.f32.mrb[16].mxu1  ;;  %v1154_v29 = vld [vmem:[#allocation2 + $0x120] sm:$0xff] }
 0x2b0   : > { %v1519_v40 = vadd.f32 %v1360_v32, %v1134_v38  ;;  %v1362_v34 = vpop.f32.mrb[17].mxu1  ;;  %v1155_v38 = vld [vmem:[#allocation2 + $0x128] sm:$0xff] }
 0x2b1   : > { %v1520_v42 = vadd.f32 %v1362_v34, %v1135_v27 }
 0x2b2   : > { %1583 = vst [vmem:[#allocation2 + $0x80] sm:$0xff] %v1519_v40 }
 0x2b3   : > { %1584 = vst [vmem:[#allocation2 + $0x88] sm:$0xff] %v1520_v42  ;;  %v1366_v39 = vpop.f32.mrb[18].mxu1  ;;  %v1156_v42 = vld [vmem:[#allocation2 + $0x130] sm:$0xff] }
 0x2b4   : > { %v1521_v44 = vadd.f32 %v1366_v39, %v1136_v37  ;;  %v1368_v36 = vpop.f32.mrb[19].mxu1  ;;  %v1157_v37 = vld [vmem:[#allocation2 + $0x138] sm:$0xff] }
 0x2b5   : > { %v1522_v45 = vadd.f32 %v1368_v36, %v1137_v43 }
 0x2b6   : > { %1585 = vst [vmem:[#allocation2 + $0x90] sm:$0xff] %v1521_v44 }
 0x2b7   : > { %1586 = vst [vmem:[#allocation2 + $0x98] sm:$0xff] %v1522_v45  ;;  %v1372_v51 = vpop.f32.mrb[20].mxu1  ;;  %v1158_v45 = vld [vmem:[#allocation2 + $0x140] sm:$0xff] }
 0x2b8   : > { %v1523_v41 = vadd.f32 %v1372_v51, %v1138_v47  ;;  %v1374_v46 = vpop.f32.mrb[21].mxu1  ;;  %v1159_v47 = vld [vmem:[#allocation2 + $0x148] sm:$0xff] }
 0x2b9   : > { %v1524_v54 = vadd.f32 %v1374_v46, %v1139_v49 }
 0x2ba   : > { %1587 = vst [vmem:[#allocation2 + $0xa0] sm:$0xff] %v1523_v41 }
 0x2bb   : > { %1588 = vst [vmem:[#allocation2 + $0xa8] sm:$0xff] %v1524_v54  ;;  %v1378_v50 = vpop.f32.mrb[22].mxu1  ;;  %v1160_v54 = vld [vmem:[#allocation2 + $0x150] sm:$0xff] }
 0x2bc   : > { %v1525_v52 = vadd.f32 %v1378_v50, %v1140_v48  ;;  %v1380_v57 = vpop.f32.mrb[23].mxu1  ;;  %v1161_v48 = vld [vmem:[#allocation2 + $0x158] sm:$0xff] }
 0x2bd   : > { %v1526_v53 = vadd.f32 %v1380_v57, %v1141_v56 }
 0x2be   : > { %1589 = vst [vmem:[#allocation2 + $0xb0] sm:$0xff] %v1525_v52 }
 0x2bf   : > { %1590 = vst [vmem:[#allocation2 + $0xb8] sm:$0xff] %v1526_v53  ;;  %v1384_v61 = vpop.f32.mrb[24].mxu1  ;;  %v1162_v53 = vld [vmem:[#allocation2 + $0x160] sm:$0xff] }
 0x2c0   : > { %v1527_v63 = vadd.f32 %v1384_v61, %v1142_v58  ;;  %v1386_v1 = vpop.f32.mrb[25].mxu1  ;;  %v1163_v58 = vld [vmem:[#allocation2 + $0x168] sm:$0xff] }
 0x2c1   : > { %v1528_v60 = vadd.f32 %v1386_v1, %v1143_v59 }
 0x2c2   : > { %1591 = vst [vmem:[#allocation2 + $0xc0] sm:$0xff] %v1527_v63 }
 0x2c3   : > { %1592 = vst [vmem:[#allocation2 + $0xc8] sm:$0xff] %v1528_v60  ;;  %v1390_v62 = vpop.f32.mrb[26].mxu1  ;;  %v1164_v60 = vld [vmem:[#allocation2 + $0x170] sm:$0xff] }
 0x2c4   : > { %v1529_v11 = vadd.f32 %v1390_v62, %v1144_v9  ;;  %v1392_v0 = vpop.f32.mrb[27].mxu1  ;;  %v1165_v9 = vld [vmem:[#allocation2 + $0x178] sm:$0xff] }
 0x2c5   : > { %v1530_v12 = vadd.f32 %v1392_v0, %v1145_v55 }
 0x2c6   : > { %1593 = vst [vmem:[#allocation2 + $0xd0] sm:$0xff] %v1529_v11 }
 0x2c7   : > { %1594 = vst [vmem:[#allocation2 + $0xd8] sm:$0xff] %v1530_v12  ;;  %v1396_v13 = vpop.f32.mrb[28].mxu1  ;;  %v1166_v12 = vld [vmem:[#allocation2 + $0x180] sm:$0xff] }
 0x2c8   : > { %v1531_v14 = vadd.f32 %v1396_v13, %v1146_v4  ;;  %v1398_v16 = vpop.f32.mrb[29].mxu1  ;;  %v1167_v4 = vld [vmem:[#allocation2 + $0x188] sm:$0xff] }
 0x2c9   : > { %v1532_v18 = vadd.f32 %v1398_v16, %v1147_v8 }
 0x2ca   : > { %1595 = vst [vmem:[#allocation2 + $0xe0] sm:$0xff] %v1531_v14 }
 0x2cb   : > { %1596 = vst [vmem:[#allocation2 + $0xe8] sm:$0xff] %v1532_v18  ;;  %v1402_v23 = vpop.f32.mrb[30].mxu1  ;;  %v1168_v18 = vld [vmem:[#allocation2 + $0x190] sm:$0xff] }
 0x2cc   : > { %v1533_v10 = vadd.f32 %v1402_v23, %v1148_v20  ;;  %v1404_v17 = vpop.f32.mrb[31].mxu1  ;;  %v1169_v20 = vld [vmem:[#allocation2 + $0x198] sm:$0xff] }
 0x2cd   : > { %v1534_v6 = vadd.f32 %v1404_v17, %v1149_v15 }
 0x2ce   : > { %1597 = vst [vmem:[#allocation2 + $0xf0] sm:$0xff] %v1533_v10 }
 0x2cf   : > { %1598 = vst [vmem:[#allocation2 + $0xf8] sm:$0xff] %v1534_v6  ;;  %v1408_v7 = vpop.f32.mrb[32].mxu1  ;;  %v1170_v6 = vld [vmem:[#allocation2 + $0x1a0] sm:$0xff] }
 0x2d0   : > { %v1535_v19 = vadd.f32 %v1408_v7, %v1150_v21  ;;  %v1410_v26 = vpop.f32.mrb[33].mxu1  ;;  %v1171_v21 = vld [vmem:[#allocation2 + $0x1a8] sm:$0xff] }
 0x2d1   : > { %v1536_v22 = vadd.f32 %v1410_v26, %v1151_v25 }
 0x2d2   : > { %1599 = vst [vmem:[#allocation2 + $0x100] sm:$0xff] %v1535_v19 }
 0x2d3   : > { %1600 = vst [vmem:[#allocation2 + $0x108] sm:$0xff] %v1536_v22  ;;  %v1414_v31 = vpop.f32.mrb[34].mxu1  ;;  %v1172_v22 = vld [vmem:[#allocation2 + $0x1b0] sm:$0xff] }
 0x2d4   : > { %v1537_v24 = vadd.f32 %v1414_v31, %v1152_v28  ;;  %v1416_v33 = vpop.f32.mrb[35].mxu1  ;;  %v1173_v28 = vld [vmem:[#allocation2 + $0x1b8] sm:$0xff] }
 0x2d5   : > { %v1538_v35 = vadd.f32 %v1416_v33, %v1153_v30 }
 0x2d6   : > { %1601 = vst [vmem:[#allocation2 + $0x110] sm:$0xff] %v1537_v24 }
 0x2d7   : > { %1602 = vst [vmem:[#allocation2 + $0x118] sm:$0xff] %v1538_v35  ;;  %v1420_v27 = vpop.f32.mrb[36].mxu1  ;;  %v1174_v35 = vld [vmem:[#allocation2 + $0x1c0] sm:$0xff] }
 0x2d8   : > { %v1539_v32 = vadd.f32 %v1420_v27, %v1154_v29  ;;  %v1422_v40 = vpop.f32.mrb[37].mxu1  ;;  %v1175_v29 = vld [vmem:[#allocation2 + $0x1c8] sm:$0xff] }
 0x2d9   : > { %v1540_v34 = vadd.f32 %v1422_v40, %v1155_v38 }
 0x2da   : > { %1603 = vst [vmem:[#allocation2 + $0x120] sm:$0xff] %v1539_v32 }
 0x2db   : > { %1604 = vst [vmem:[#allocation2 + $0x128] sm:$0xff] %v1540_v34  ;;  %v1426_v43 = vpop.f32.mrb[38].mxu1  ;;  %v1176_v34 = vld [vmem:[#allocation2 + $0x1d0] sm:$0xff] }
 0x2dc   : > { %v1541_v39 = vadd.f32 %v1426_v43, %v1156_v42  ;;  %v1428_v44 = vpop.f32.mrb[39].mxu1  ;;  %v1177_v42 = vld [vmem:[#allocation2 + $0x1d8] sm:$0xff] }
 0x2dd   : > { %v1542_v36 = vadd.f32 %v1428_v44, %v1157_v37 }
 0x2de   : > { %1605 = vst [vmem:[#allocation2 + $0x130] sm:$0xff] %v1541_v39 }
 0x2df   : > { %1606 = vst [vmem:[#allocation2 + $0x138] sm:$0xff] %v1542_v36  ;;  %v1432_v49 = vpop.f32.mrb[40].mxu1  ;;  %v1178_v36 = vld [vmem:[#allocation2 + $0x1e0] sm:$0xff] }
 0x2e0   : > { %v1543_v51 = vadd.f32 %v1432_v49, %v1158_v45  ;;  %v1434_v41 = vpop.f32.mrb[41].mxu1  ;;  %v1179_v45 = vld [vmem:[#allocation2 + $0x1e8] sm:$0xff] }
 0x2e1   : > { %v1544_v46 = vadd.f32 %v1434_v41, %v1159_v47 }
 0x2e2   : > { %1607 = vst [vmem:[#allocation2 + $0x140] sm:$0xff] %v1543_v51 }
 0x2e3   : > { %1608 = vst [vmem:[#allocation2 + $0x148] sm:$0xff] %v1544_v46  ;;  %v1438_v56 = vpop.f32.mrb[42].mxu1  ;;  %v1180_v46 = vld [vmem:[#allocation2 + $0x1f0] sm:$0xff] }
 0x2e4   : > { %v1545_v50 = vadd.f32 %v1438_v56, %v1160_v54  ;;  %v1440_v52 = vpop.f32.mrb[43].mxu1  ;;  %v1181_v54 = vld [vmem:[#allocation2 + $0x1f8] sm:$0xff] }
 0x2e5   : > { %v1546_v57 = vadd.f32 %v1440_v52, %v1161_v48 }
 0x2e6   : > { %1609 = vst [vmem:[#allocation2 + $0x150] sm:$0xff] %v1545_v50 }
 0x2e7   : > { %1610 = vst [vmem:[#allocation2 + $0x158] sm:$0xff] %v1546_v57  ;;  %v1444_v59 = vpop.f32.mrb[44].mxu1  ;;  %v1635_v57 = vld [vmem:[#allocation2] sm:$0xff] (!%p1973_p1) }
 0x2e8   : > { %v1547_v61 = vadd.f32 %v1444_v59, %v1162_v53  ;;  %v1446_v63 = vpop.f32.mrb[45].mxu1  ;;  %v1699_v53 = vld [vmem:[%s3345_s4] sm:$0x3] (!%p1973_p1) }
 0x2e9   : > { %v1548_v1 = vadd.f32 %v1446_v63, %v1163_v58  ;;  %v1636_v58 = vld [vmem:[#allocation2 + $0x8] sm:$0xff] (!%p1973_p1)  ;;  %v3230_v59 = vrot.slane (!%p1973_p1), %v1699_v53, %v533_v3  ;;  %v1637_v63 = vld [vmem:[#allocation2 + $0x10] sm:$0xff] (!%p1973_p1)  ;;  %v1643_v3 = vld [vmem:[#allocation2 + $0x40] sm:$0xff] (!%p1973_p1) }
 0x2ea   : > { %1611 = vst [vmem:[#allocation2 + $0x160] sm:$0xff] %v1547_v61  ;;  %v3234_v61 = vrot.slane (!%p1973_p1), %v1699_v53, %v537_v5 }
 0x2eb   : > { %1612 = vst [vmem:[#allocation2 + $0x168] sm:$0xff] %v1548_v1  ;;  %v1450_v55 = vpop.f32.mrb[46].mxu1  ;;  %v1638_v1 = vld [vmem:[#allocation2 + $0x18] sm:$0xff] (!%p1973_p1) }
 0x2ec   : > { %v1549_v62 = vadd.f32 %v1450_v55, %v1164_v60  ;;  %v1452_v11 = vpop.f32.mrb[47].mxu1  ;;  %v1639_v60 = vld [vmem:[#allocation2 + $0x20] sm:$0xff] (!%p1973_p1)  ;;  %v1641_v55 = vld [vmem:[#allocation2 + $0x30] sm:$0xff] (!%p1973_p1) }
 0x2ed   : > { %v1550_v0 = vadd.f32 %v1452_v11, %v1165_v9  ;;  %v1640_v9 = vld [vmem:[#allocation2 + $0x28] sm:$0xff] (!%p1973_p1)  ;;  %v1711_v11 = vadd.f32 (!%p1973_p1), %v3230_v59, %v1635_v57  ;;  %v1715_v2 = vadd.f32 (!%p1973_p1), %v3230_v59, %v1639_v60  ;;  %v1669_v60 = vld [vmem:[#allocation2 + $0x110] sm:$0xff] (!%p1973_p1) }
 0x2ee   : > { %1613 = vst [vmem:[#allocation2 + $0x170] sm:$0xff] %v1549_v62  ;;  %v1642_v62 = vld [vmem:[#allocation2 + $0x38] sm:$0xff] (!%p1973_p1)  ;;  %v1716_v5 = vadd.f32 (!%p1973_p1), %v3234_v61, %v1640_v9 }
 0x2ef   : > { %1614 = vst [vmem:[#allocation2 + $0x178] sm:$0xff] %v1550_v0  ;;  %v1456_v8 = vpop.f32.mrb[48].mxu1  ;;  %v1712_v0 = vadd.f32 (!%p1973_p1), %v3234_v61, %v1636_v58  ;;  %1775 = vst [vmem:[#allocation9] sm:$0xff] (!%p1973_p1), %v1711_v11  ;;  %v1670_v11 = vld [vmem:[#allocation2 + $0x118] sm:$0xff] (!%p1973_p1) }
 0x2f0   : > { %v1551_v13 = vadd.f32 %v1456_v8, %v1166_v12  ;;  %v1458_v14 = vpop.f32.mrb[49].mxu1  ;;  %v1713_v12 = vadd.f32 (!%p1973_p1), %v3230_v59, %v1637_v63  ;;  %v1644_v8 = vld [vmem:[#allocation2 + $0x48] sm:$0xff] (!%p1973_p1)  ;;  %1779 = vst [vmem:[#allocation9 + $0x20] sm:$0xff] (!%p1973_p1), %v1715_v2  ;;  %1780 = vst [vmem:[#allocation9 + $0x28] sm:$0xff] (!%p1973_p1), %v1716_v5  ;;  %v1667_v63 = vld [vmem:[#allocation2 + $0x100] sm:$0xff] (!%p1973_p1) }
 0x2f1   : > { %v1552_v16 = vadd.f32 %v1458_v14, %v1167_v4  ;;  %v1714_v4 = vadd.f32 (!%p1973_p1), %v3234_v61, %v1638_v1  ;;  %v1717_v14 = vadd.f32 (!%p1973_p1), %v3230_v59, %v1641_v55  ;;  %1776 = vst [vmem:[#allocation9 + $0x8] sm:$0xff] (!%p1973_p1), %v1712_v0  ;;  %v1668_v1 = vld [vmem:[#allocation2 + $0x108] sm:$0xff] (!%p1973_p1)  ;;  %v1743_v9 = vadd.f32 (!%p1973_p1), %v3230_v59, %v1667_v63  ;;  %v1671_v0 = vld [vmem:[#allocation2 + $0x120] sm:$0xff] (!%p1973_p1)  ;;  %v1674_v2 = vld [vmem:[#allocation2 + $0x138] sm:$0xff] (!%p1973_p1) }
 0x2f2   : > { %1615 = vst [vmem:[#allocation2 + $0x180] sm:$0xff] %v1551_v13  ;;  %v1645_v13 = vld [vmem:[#allocation2 + $0x50] sm:$0xff] (!%p1973_p1)  ;;  %1777 = vst [vmem:[#allocation9 + $0x10] sm:$0xff] (!%p1973_p1), %v1713_v12  ;;  %v1744_v55 = vadd.f32 (!%p1973_p1), %v3234_v61, %v1668_v1  ;;  %v1672_v12 = vld [vmem:[#allocation2 + $0x128] sm:$0xff] (!%p1973_p1) }
 0x2f3   : > { %1616 = vst [vmem:[#allocation2 + $0x188] sm:$0xff] %v1552_v16  ;;  %v1462_v15 = vpop.f32.mrb[50].mxu1  ;;  %v1718_v16 = vadd.f32 (!%p1973_p1), %v3234_v61, %v1642_v62  ;;  %1778 = vst [vmem:[#allocation9 + $0x18] sm:$0xff] (!%p1973_p1), %v1714_v4  ;;  %v1745_v62 = vadd.f32 (!%p1973_p1), %v3230_v59, %v1669_v60  ;;  %v1746_v4 = vadd.f32 (!%p1973_p1), %v3234_v61, %v1670_v11  ;;  %v1675_v5 = vld [vmem:[#allocation2 + $0x140] sm:$0xff] (!%p1973_p1) }
 0x2f4   : > { %v1553_v23 = vadd.f32 %v1462_v15, %v1168_v18  ;;  %v1464_v10 = vpop.f32.mrb[51].mxu1  ;;  %v1646_v18 = vld [vmem:[#allocation2 + $0x58] sm:$0xff] (!%p1973_p1)  ;;  %v1648_v15 = vld [vmem:[#allocation2 + $0x68] sm:$0xff] (!%p1973_p1)  ;;  %1781 = vst [vmem:[#allocation9 + $0x30] sm:$0xff] (!%p1973_p1), %v1717_v14  ;;  %1807 = vst [vmem:[#allocation9 + $0x100] sm:$0xff] (!%p1973_p1), %v1743_v9 }
 0x2f5   : > { %v1554_v17 = vadd.f32 %v1464_v10, %v1169_v20  ;;  %v1647_v20 = vld [vmem:[#allocation2 + $0x60] sm:$0xff] (!%p1973_p1)  ;;  %v1720_v10 = vadd.f32 (!%p1973_p1), %v3234_v61, %v1644_v8  ;;  %1782 = vst [vmem:[#allocation9 + $0x38] sm:$0xff] (!%p1973_p1), %v1718_v16  ;;  %v1748_v8 = vadd.f32 (!%p1973_p1), %v3234_v61, %v1672_v12  ;;  %1808 = vst [vmem:[#allocation9 + $0x108] sm:$0xff] (!%p1973_p1), %v1744_v55 }
 0x2f6   : > { %1617 = vst [vmem:[#allocation2 + $0x190] sm:$0xff] %v1553_v23  ;;  %v1719_v23 = vadd.f32 (!%p1973_p1), %v3230_v59, %v1643_v3  ;;  %v1747_v3 = vadd.f32 (!%p1973_p1), %v3230_v59, %v1671_v0  ;;  %1809 = vst [vmem:[#allocation9 + $0x110] sm:$0xff] (!%p1973_p1), %v1745_v62  ;;  %v1750_v16 = vadd.f32 (!%p1973_p1), %v3234_v61, %v1674_v2 }
 0x2f7   : > { %1618 = vst [vmem:[#allocation2 + $0x198] sm:$0xff] %v1554_v17  ;;  %v1468_v25 = vpop.f32.mrb[52].mxu1  ;;  %v1721_v17 = vadd.f32 (!%p1973_p1), %v3230_v59, %v1645_v13  ;;  %1784 = vst [vmem:[#allocation9 + $0x48] sm:$0xff] (!%p1973_p1), %v1720_v10  ;;  %v1673_v13 = vld [vmem:[#allocation2 + $0x130] sm:$0xff] (!%p1973_p1) }
 0x2f8   : > { %v1555_v7 = vadd.f32 %v1468_v25, %v1170_v6  ;;  %v1470_v19 = vpop.f32.mrb[53].mxu1  ;;  %v1722_v6 = vadd.f32 (!%p1973_p1), %v3234_v61, %v1646_v18  ;;  %v1650_v25 = vld [vmem:[#allocation2 + $0x78] sm:$0xff] (!%p1973_p1)  ;;  %1783 = vst [vmem:[#allocation9 + $0x40] sm:$0xff] (!%p1973_p1), %v1719_v23  ;;  %v1749_v14 = vadd.f32 (!%p1973_p1), %v3230_v59, %v1673_v13  ;;  %v1751_v18 = vadd.f32 (!%p1973_p1), %v3230_v59, %v1675_v5 }
 0x2f9   : > { %v1556_v26 = vadd.f32 %v1470_v19, %v1171_v21  ;;  %v1649_v21 = vld [vmem:[#allocation2 + $0x70] sm:$0xff] (!%p1973_p1)  ;;  %v1723_v19 = vadd.f32 (!%p1973_p1), %v3230_v59, %v1647_v20  ;;  %1785 = vst [vmem:[#allocation9 + $0x50] sm:$0xff] (!%p1973_p1), %v1721_v17  ;;  %v1676_v20 = vld [vmem:[#allocation2 + $0x148] sm:$0xff] (!%p1973_p1)  ;;  %v1678_v23 = vld [vmem:[#allocation2 + $0x158] sm:$0xff] (!%p1973_p1) }
 0x2fa   : > { %1619 = vst [vmem:[#allocation2 + $0x1a0] sm:$0xff] %v1555_v7  ;;  %v1651_v7 = vld [vmem:[#allocation2 + $0x80] sm:$0xff] (!%p1973_p1)  ;;  %1786 = vst [vmem:[#allocation9 + $0x58] sm:$0xff] (!%p1973_p1), %v1722_v6  ;;  %v1752_v10 = vadd.f32 (!%p1973_p1), %v3234_v61, %v1676_v20  ;;  %v1754_v6 = vadd.f32 (!%p1973_p1), %v3234_v61, %v1678_v23 }
 0x2fb   : > { %1620 = vst [vmem:[#allocation2 + $0x1a8] sm:$0xff] %v1556_v26  ;;  %v1474_v30 = vpop.f32.mrb[54].mxu1  ;;  %v1724_v26 = vadd.f32 (!%p1973_p1), %v3234_v61, %v1648_v15  ;;  %1787 = vst [vmem:[#allocation9 + $0x60] sm:$0xff] (!%p1973_p1), %v1723_v19  ;;  %v1677_v15 = vld [vmem:[#allocation2 + $0x150] sm:$0xff] (!%p1973_p1) }
 0x2fc   : > { %v1557_v31 = vadd.f32 %v1474_v30, %v1172_v22  ;;  %v1476_v24 = vpop.f32.mrb[55].mxu1  ;;  %v1725_v22 = vadd.f32 (!%p1973_p1), %v3230_v59, %v1649_v21  ;;  %v1652_v30 = vld [vmem:[#allocation2 + $0x88] sm:$0xff] (!%p1973_p1)  ;;  %1810 = vst [vmem:[#allocation9 + $0x118] sm:$0xff] (!%p1973_p1), %v1746_v4  ;;  %1811 = vst [vmem:[#allocation9 + $0x120] sm:$0xff] (!%p1973_p1), %v1747_v3  ;;  %v1753_v17 = vadd.f32 (!%p1973_p1), %v3230_v59, %v1677_v15  ;;  %v1679_v21 = vld [vmem:[#allocation2 + $0x160] sm:$0xff] (!%p1973_p1) }
 0x2fd   : > { %v1558_v33 = vadd.f32 %v1476_v24, %v1173_v28  ;;  %v1726_v28 = vadd.f32 (!%p1973_p1), %v3234_v61, %v1650_v25  ;;  %v1654_v24 = vld [vmem:[#allocation2 + $0x98] sm:$0xff] (!%p1973_p1)  ;;  %1788 = vst [vmem:[#allocation9 + $0x68] sm:$0xff] (!%p1973_p1), %v1724_v26  ;;  %1812 = vst [vmem:[#allocation9 + $0x128] sm:$0xff] (!%p1973_p1), %v1748_v8  ;;  %v1680_v25 = vld [vmem:[#allocation2 + $0x168] sm:$0xff] (!%p1973_p1)  ;;  %v1755_v19 = vadd.f32 (!%p1973_p1), %v3230_v59, %v1679_v21 }
 0x2fe   : > { %1621 = vst [vmem:[#allocation2 + $0x1b0] sm:$0xff] %v1557_v31  ;;  %v1653_v31 = vld [vmem:[#allocation2 + $0x90] sm:$0xff] (!%p1973_p1)  ;;  %1789 = vst [vmem:[#allocation9 + $0x70] sm:$0xff] (!%p1973_p1), %v1725_v22  ;;  %v1756_v26 = vadd.f32 (!%p1973_p1), %v3234_v61, %v1680_v25 }
 0x2ff   : > { %1622 = vst [vmem:[#allocation2 + $0x1b8] sm:$0xff] %v1558_v33  ;;  %v1480_v38 = vpop.f32.mrb[56].mxu1  ;;  %v1727_v33 = vadd.f32 (!%p1973_p1), %v3230_v59, %v1651_v7  ;;  %1790 = vst [vmem:[#allocation9 + $0x78] sm:$0xff] (!%p1973_p1), %v1726_v28  ;;  %v1681_v7 = vld [vmem:[#allocation2 + $0x170] sm:$0xff] (!%p1973_p1)  ;;  %v1682_v28 = vld [vmem:[#allocation2 + $0x178] sm:$0xff] (!%p1973_p1) }
 0x300   : > { %v1559_v27 = vadd.f32 %v1480_v38, %v1174_v35  ;;  %v1482_v32 = vpop.f32.mrb[57].mxu1  ;;  %v1728_v35 = vadd.f32 (!%p1973_p1), %v3234_v61, %v1652_v30  ;;  %v1730_v38 = vadd.f32 (!%p1973_p1), %v3234_v61, %v1654_v24  ;;  %1813 = vst [vmem:[#allocation9 + $0x130] sm:$0xff] (!%p1973_p1), %v1749_v14  ;;  %1814 = vst [vmem:[#allocation9 + $0x138] sm:$0xff] (!%p1973_p1), %v1750_v16  ;;  %v1683_v30 = vld [vmem:[#allocation2 + $0x180] sm:$0xff] (!%p1973_p1) }
 0x301   : > { %v1560_v40 = vadd.f32 %v1482_v32, %v1175_v29  ;;  %v1729_v29 = vadd.f32 (!%p1973_p1), %v3230_v59, %v1653_v31  ;;  %v1656_v32 = vld [vmem:[#allocation2 + $0xa8] sm:$0xff] (!%p1973_p1)  ;;  %1791 = vst [vmem:[#allocation9 + $0x80] sm:$0xff] (!%p1973_p1), %v1727_v33  ;;  %1815 = vst [vmem:[#allocation9 + $0x140] sm:$0xff] (!%p1973_p1), %v1751_v18  ;;  %v1757_v22 = vadd.f32 (!%p1973_p1), %v3230_v59, %v1681_v7 }
 0x302   : > { %1623 = vst [vmem:[#allocation2 + $0x1c0] sm:$0xff] %v1559_v27  ;;  %v1655_v27 = vld [vmem:[#allocation2 + $0xa0] sm:$0xff] (!%p1973_p1)  ;;  %1792 = vst [vmem:[#allocation9 + $0x88] sm:$0xff] (!%p1973_p1), %v1728_v35  ;;  %v1684_v31 = vld [vmem:[#allocation2 + $0x188] sm:$0xff] (!%p1973_p1)  ;;  %v1758_v24 = vadd.f32 (!%p1973_p1), %v3234_v61, %v1682_v28  ;;  %v1759_v33 = vadd.f32 (!%p1973_p1), %v3230_v59, %v1683_v30 }
 0x303   : > { %1624 = vst [vmem:[#allocation2 + $0x1c8] sm:$0xff] %v1560_v40  ;;  %v1486_v37 = vpop.f32.mrb[58].mxu1  ;;  %v1657_v40 = vld [vmem:[#allocation2 + $0xb0] sm:$0xff] (!%p1973_p1)  ;;  %1793 = vst [vmem:[#allocation9 + $0x90] sm:$0xff] (!%p1973_p1), %v1729_v29  ;;  %v1760_v35 = vadd.f32 (!%p1973_p1), %v3234_v61, %v1684_v31 }
 0x304   : > { %v1561_v43 = vadd.f32 %v1486_v37, %v1176_v34  ;;  %v1488_v39 = vpop.f32.mrb[59].mxu1  ;;  %v1731_v34 = vadd.f32 (!%p1973_p1), %v3230_v59, %v1655_v27  ;;  %v1733_v37 = vadd.f32 (!%p1973_p1), %v3230_v59, %v1657_v40  ;;  %1794 = vst [vmem:[#allocation9 + $0x98] sm:$0xff] (!%p1973_p1), %v1730_v38  ;;  %1816 = vst [vmem:[#allocation9 + $0x148] sm:$0xff] (!%p1973_p1), %v1752_v10  ;;  %v1685_v29 = vld [vmem:[#allocation2 + $0x190] sm:$0xff] (!%p1973_p1)  ;;  %v1686_v38 = vld [vmem:[#allocation2 + $0x198] sm:$0xff] (!%p1973_p1) }
 0x305   : > { %v1562_v44 = vadd.f32 %v1488_v39, %v1177_v42  ;;  %v1732_v42 = vadd.f32 (!%p1973_p1), %v3234_v61, %v1656_v32  ;;  %v1659_v39 = vld [vmem:[#allocation2 + $0xc0] sm:$0xff] (!%p1973_p1)  ;;  %1817 = vst [vmem:[#allocation9 + $0x150] sm:$0xff] (!%p1973_p1), %v1753_v17  ;;  %1818 = vst [vmem:[#allocation9 + $0x158] sm:$0xff] (!%p1973_p1), %v1754_v6  ;;  %v1761_v32 = vadd.f32 (!%p1973_p1), %v3230_v59, %v1685_v29 }
 0x306   : > { %1625 = vst [vmem:[#allocation2 + $0x1d0] sm:$0xff] %v1561_v43  ;;  %v1658_v43 = vld [vmem:[#allocation2 + $0xb8] sm:$0xff] (!%p1973_p1)  ;;  %1795 = vst [vmem:[#allocation9 + $0xa0] sm:$0xff] (!%p1973_p1), %v1731_v34  ;;  %v1687_v27 = vld [vmem:[#allocation2 + $0x1a0] sm:$0xff] (!%p1973_p1)  ;;  %v1762_v40 = vadd.f32 (!%p1973_p1), %v3234_v61, %v1686_v38 }
 0x307   : > { %1626 = vst [vmem:[#allocation2 + $0x1d8] sm:$0xff] %v1562_v44  ;;  %v1492_v47 = vpop.f32.mrb[60].mxu1  ;;  %v1660_v44 = vld [vmem:[#allocation2 + $0xc8] sm:$0xff] (!%p1973_p1)  ;;  %1796 = vst [vmem:[#allocation9 + $0xa8] sm:$0xff] (!%p1973_p1), %v1732_v42  ;;  %v1763_v34 = vadd.f32 (!%p1973_p1), %v3230_v59, %v1687_v27 }
 0x308   : > { %v1563_v49 = vadd.f32 %v1492_v47, %v1178_v36  ;;  %v1494_v51 = vpop.f32.mrb[61].mxu1  ;;  %v1734_v36 = vadd.f32 (!%p1973_p1), %v3234_v61, %v1658_v43  ;;  %v1736_v47 = vadd.f32 (!%p1973_p1), %v3234_v61, %v1660_v44  ;;  %1797 = vst [vmem:[#allocation9 + $0xb0] sm:$0xff] (!%p1973_p1), %v1733_v37  ;;  %1819 = vst [vmem:[#allocation9 + $0x160] sm:$0xff] (!%p1973_p1), %v1755_v19  ;;  %v1688_v42 = vld [vmem:[#allocation2 + $0x1a8] sm:$0xff] (!%p1973_p1)  ;;  %v1689_v37 = vld [vmem:[#allocation2 + $0x1b0] sm:$0xff] (!%p1973_p1) }
 0x309   : > { %v1564_v41 = vadd.f32 %v1494_v51, %v1179_v45  ;;  %1634 = sbr.rel (%p1973_p1) target bundleno = 794 (0x31a), region = 60  ;;  %v1735_v45 = vadd.f32 (!%p1973_p1), %v3230_v59, %v1659_v39  ;;  %v1662_v51 = vld [vmem:[#allocation2 + $0xd8] sm:$0xff] (!%p1973_p1)  ;;  %1820 = vst [vmem:[#allocation9 + $0x168] sm:$0xff] (!%p1973_p1), %v1756_v26  ;;  %1821 = vst [vmem:[#allocation9 + $0x170] sm:$0xff] (!%p1973_p1), %v1757_v22  ;;  %v1764_v39 = vadd.f32 (!%p1973_p1), %v3234_v61, %v1688_v42 }
 0x30a   : > { %1627 = vst [vmem:[#allocation2 + $0x1e0] sm:$0xff] %v1563_v49  ;;  %v1661_v49 = vld [vmem:[#allocation2 + $0xd0] sm:$0xff] (!%p1973_p1)  ;;  %1798 = vst [vmem:[#allocation9 + $0xb8] sm:$0xff] (!%p1973_p1), %v1734_v36  ;;  %v1690_v43 = vld [vmem:[#allocation2 + $0x1b8] sm:$0xff] (!%p1973_p1)  ;;  %v1765_v44 = vadd.f32 (!%p1973_p1), %v3230_v59, %v1689_v37 }
 0x30b   : > { %1628 = vst [vmem:[#allocation2 + $0x1e8] sm:$0xff] %v1564_v41  ;;  %v1498_v48 = vpop.f32.mrb[62].mxu1  ;;  %v1663_v41 = vld [vmem:[#allocation2 + $0xe0] sm:$0xff] (!%p1973_p1)  ;;  %1799 = vst [vmem:[#allocation9 + $0xc0] sm:$0xff] (!%p1973_p1), %v1735_v45  ;;  %v1766_v36 = vadd.f32 (!%p1973_p1), %v3234_v61, %v1690_v43 }
 0x30c   : > { %v1565_v56 = vadd.f32 %v1498_v48, %v1180_v46  ;;  %v1500_v50 = vpop.f32.mrb[63].mxu1  ;;  %v1737_v46 = vadd.f32 (!%p1973_p1), %v3230_v59, %v1661_v49  ;;  %v1739_v48 = vadd.f32 (!%p1973_p1), %v3230_v59, %v1663_v41  ;;  %1800 = vst [vmem:[#allocation9 + $0xc8] sm:$0xff] (!%p1973_p1), %v1736_v47  ;;  %1822 = vst [vmem:[#allocation9 + $0x178] sm:$0xff] (!%p1973_p1), %v1758_v24  ;;  %v1691_v45 = vld [vmem:[#allocation2 + $0x1c0] sm:$0xff] (!%p1973_p1)  ;;  %v1692_v47 = vld [vmem:[#allocation2 + $0x1c8] sm:$0xff] (!%p1973_p1) }
 0x30d   : > { %v1566_v52 = vadd.f32 %v1500_v50, %v1181_v54  ;;  %v1738_v54 = vadd.f32 (!%p1973_p1), %v3234_v61, %v1662_v51  ;;  %v1665_v50 = vld [vmem:[#allocation2 + $0xf0] sm:$0xff] (!%p1973_p1)  ;;  %1823 = vst [vmem:[#allocation9 + $0x180] sm:$0xff] (!%p1973_p1), %v1759_v33  ;;  %1824 = vst [vmem:[#allocation9 + $0x188] sm:$0xff] (!%p1973_p1), %v1760_v35  ;;  %v1767_v51 = vadd.f32 (!%p1973_p1), %v3230_v59, %v1691_v45 }
 0x30e   : > { %1629 = vst [vmem:[#allocation2 + $0x1f0] sm:$0xff] %v1565_v56  ;;  %v1664_v56 = vld [vmem:[#allocation2 + $0xe8] sm:$0xff] (!%p1973_p1)  ;;  %v1741_v53 = vadd.f32 (!%p1973_p1), %v3230_v59, %v1665_v50  ;;  %1801 = vst [vmem:[#allocation9 + $0xd0] sm:$0xff] (!%p1973_p1), %v1737_v46  ;;  %v1693_v49 = vld [vmem:[#allocation2 + $0x1d0] sm:$0xff] (!%p1973_p1)  ;;  %v1768_v41 = vadd.f32 (!%p1973_p1), %v3234_v61, %v1692_v47 }
 0x30f   : > { %1630 = vst [vmem:[#allocation2 + $0x1f8] sm:$0xff] %v1566_v52  ;;  %v1666_v52 = vld [vmem:[#allocation2 + $0xf8] sm:$0xff] (!%p1973_p1)  ;;  %v1740_v57 = vadd.f32 (!%p1973_p1), %v3234_v61, %v1664_v56  ;;  %1802 = vst [vmem:[#allocation9 + $0xd8] sm:$0xff] (!%p1973_p1), %v1738_v54  ;;  %v1769_v46 = vadd.f32 (!%p1973_p1), %v3230_v59, %v1693_v49 }
 0x310   : > { %v1742_v58 = vadd.f32 %v3234_v61, %v1666_v52  ;;  %1803 = vst [vmem:[#allocation9 + $0xe0] sm:$0xff] %v1739_v48  ;;  %1805 = vst [vmem:[#allocation9 + $0xf0] sm:$0xff] %v1741_v53  ;;  %v1694_v54 = vld [vmem:[#allocation2 + $0x1d8] sm:$0xff] }
 0x311   : > { %1804 = vst [vmem:[#allocation9 + $0xe8] sm:$0xff] %v1740_v57  ;;  %1825 = vst [vmem:[#allocation9 + $0x190] sm:$0xff] %v1761_v32  ;;  %v1695_v48 = vld [vmem:[#allocation2 + $0x1e0] sm:$0xff]  ;;  %v1770_v50 = vadd.f32 %v3234_v61, %v1694_v54 }
 0x312   : > { %1806 = vst [vmem:[#allocation9 + $0xf8] sm:$0xff] %v1742_v58  ;;  %1826 = vst [vmem:[#allocation9 + $0x198] sm:$0xff] %v1762_v40  ;;  %v1696_v56 = vld [vmem:[#allocation2 + $0x1e8] sm:$0xff]  ;;  %v1771_v52 = vadd.f32 %v3230_v59, %v1695_v48 }
 0x313   : > { %1827 = vst [vmem:[#allocation9 + $0x1a0] sm:$0xff] %v1763_v34  ;;  %1828 = vst [vmem:[#allocation9 + $0x1a8] sm:$0xff] %v1764_v39  ;;  %v1772_v57 = vadd.f32 %v3234_v61, %v1696_v56 }
 0x314   : > { %1829 = vst [vmem:[#allocation9 + $0x1b0] sm:$0xff] %v1765_v44  ;;  %1830 = vst [vmem:[#allocation9 + $0x1b8] sm:$0xff] %v1766_v36 }
 0x315   : > { %v1697_v53 = vld [vmem:[#allocation2 + $0x1f0] sm:$0xff]  ;;  %1831 = vst [vmem:[#allocation9 + $0x1c0] sm:$0xff] %v1767_v51  ;;  %1832 = vst [vmem:[#allocation9 + $0x1c8] sm:$0xff] %v1768_v41 }
 0x316   : > { %v1698_v58 = vld [vmem:[#allocation2 + $0x1f8] sm:$0xff]  ;;  %1833 = vst [vmem:[#allocation9 + $0x1d0] sm:$0xff] %v1769_v46  ;;  %v1773_v63 = vadd.f32 %v3230_v59, %v1697_v53  ;;  %1834 = vst [vmem:[#allocation9 + $0x1d8] sm:$0xff] %v1770_v50 }
 0x317   : > { %v1774_v1 = vadd.f32 %v3234_v61, %v1698_v58  ;;  %1835 = vst [vmem:[#allocation9 + $0x1e0] sm:$0xff] %v1771_v52  ;;  %1836 = vst [vmem:[#allocation9 + $0x1e8] sm:$0xff] %v1772_v57 }
 0x318   : > { %1837 = vst [vmem:[#allocation9 + $0x1f0] sm:$0xff] %v1773_v63 }
 0x319   : > { %1838 = vst [vmem:[#allocation9 + $0x1f8] sm:$0xff] %v1774_v1 }
 0x31a PF: > { %p2135_p6 = scmp.eq.s32.totalorder %s2632_s16, 3  ;;  %s2502_s21 = smov [#allocation9]  }
 0x31b   : > { %s1849_s14 = sshll.u32 %s2502_s21, 4  ;;  %s1850_s14 = int_to_ptr.vmem [resolvable:$true] %s1849_s14 }
 0x31c   : > { %s2409_s28 = scalar_lea.vmem %s1850_s14, 8192  ;;  %p2416_p12 = scmp.lt.s32.totalorder %s1850_s14, %s1850_s14 }
 0x31d   : > { %p2410_p4 = scmp.ne.s32.totalorder %s1850_s14, %s2409_s28  ;;  %p2417_p10 = scmp.lt.s32.totalorder %s2409_s28, %s2409_s28 }
 0x31f   : > { %p2411_p7 = pnand %p2410_p4, %p2135_p6  ;;  %p2418_p0 = por %p2417_p10, %p2416_p12 }
 0x321   : > { %p2412_p9 = pneg %p2411_p7 }
 0x323   : > { %p2419_p8 = pnand %p2418_p0, %p2412_p9 }
 0x325   : > { %2422 = shalt.err (!%p2419_p8)
}
 0x326   : > { %s2423_s27 = scalar_lea.hbm %s3346_s5, 8192 }
 0x327   : > { %p2424_p13 = scmp.ne.s32.totalorder %s3346_s5, %s2423_s27  ;;  %p2429_p5 = scmp.lt.u32.totalorder %s2423_s27, %s3346_s5 }
 0x329   : > { %p2425_p2 = pnand %p2424_p13, %p2135_p6 }
 0x32b   : > { %p2426_p3 = pneg %p2425_p2 }
 0x32d   : > { %p2431_p11 = pnand %p2429_p5, %p2426_p3 }
 0x32f   : > { %2434 = shalt.err (!%p2431_p11)
}
 0x330   : > { %s2503_s15 = smov 256   ;;  %s2504_s25 = smov 16  }
 0x331   : > { %2118 = dma.vmem_to_hbm [thread:$0]  (%p2135_p6), %s1850_s14, 8192, %s3346_s5, [#allocation5], %s2503_s15, %s2503_s15, %s2504_s25  }
 0x332   : > { %2468 = dma.done.wait (%p2135_p6), [#allocation5], 8192  }
 0x333   : > { %2470 = vsyncadd (%p2135_p6), [#allocation5], 4294959104 }
 0x334 PF: > { %s20_s23 = sadd.s32 1, %s2493_s23   ;;  %s3359_s18 = smov %s2477_s19 }
 0x335   : > { %p17_p1 = scmp.ge.s32.totalorder %s20_s23, 6   ;;  %s3360_s19 = smov %s2481_s20 }
 0x336   : > { %s3361_s20 = smov %s2582_s30  ;;  %s3362_s21 = smov %s2489_s22 }
 0x337   : > { %s3363_s22 = smov %s3365_s24  ;;  %19 = sbr.rel (!%p17_p1) target bundleno = 6 (0x6), region = 106 }
 0x33e   :  { %1865 = vsyncpa [#allocation4], 1 }
 0x33f   :  { %1867 = vsyncpa [#allocation4 + $0x1], 1 }
 0x340   :  { %1868 = vsyncpa [#allocation7], 1 }
 0x341   :  { %1870 = vsyncpa [#allocation7 + $0x1], 1 }
 0x342   :  { %1871 = vsyncpa [#allocation5], 1 }
 0x343   :  { %1873 = vsyncpa [#allocation5 + $0x1], 1 }

</bundles_post_ra>
